<compile_context>
chip_gen: v7x
topology: tpu7x:2x2x1
jax: 0.10.0
libtpu: 0.0.40
codegen_flags: <defaults>
</compile_context>

<pallas_src>
import functools

import jax
import jax.numpy as jnp
from jax.experimental import pallas as pl
from jax.experimental.pallas import tpu as pltpu

EPS = 1e-5                       # nn.LayerNorm default eps
_TILE_TARGET_BYTES = 4 << 20     # ~4 MiB tiles (review: v6e/v7x want >= 4 MiB; fine on v5e)
_SQRT_HALF = 0.7071067811865476


def _pick_tile(n, c, itemsize):
    """Lane-dense tile along the flattened spatial axis (multiple of 128, or full dim)."""
    if n <= 128:
        return n
    t = min(n, max(128, _TILE_TARGET_BYTES // max(1, c * itemsize)))
    return max(128, (t // 128) * 128)


def _vmem_limit(*buffer_bytes):
    """vmem_limit_bytes from buffer math: 2x (double-buffer) per pipelined tile +
    headroom, clamped well below v7x's 64 MiB/TC physical VMEM."""
    need = 2 * sum(int(b) for b in buffer_bytes) + (4 << 20)
    return int(min(max(need, 16 << 20), 48 << 20))


def _erf(x):
    # Abramowitz & Stegun 7.1.26 erf approximation (|err| < 1.5e-7).  Uses only
    # exp + VPU arithmetic, so it lowers cleanly in Mosaic and rides the EUP slot.
    a1, a2, a3, a4, a5 = 0.254829592, -0.284496736, 1.421413741, -1.453152027, 1.061405429
    p = 0.3275911
    ax = jnp.abs(x)
    t = 1.0 / (1.0 + p * ax)
    poly = ((((a5 * t + a4) * t + a3) * t + a2) * t + a1) * t
    y = 1.0 - poly * jnp.exp(-ax * ax)
    return jnp.where(x < 0.0, -y, y)


# ----------------------------------------------------------------------------
# 1x1 conv with fused NHWC -> NCHW transpose (proj_offset).
# ----------------------------------------------------------------------------
def _conv1x1_cl2cf_kernel(x_ref, w_ref, b_ref, o_ref):
    # x_ref: (1, T, Cin) tile of the channels-last input.  Contract over Cin (the
    # last dim of BOTH operands) on the MXU, producing the channels-first
    # (Cout, T) tile directly -- the layout transpose is free.
    y = jax.lax.dot_general(w_ref[...], x_ref[0], (((1,), (1,)), ((), ())),
                            preferred_element_type=jnp.float32)
    o_ref[0] = (y + b_ref[...]).astype(o_ref.dtype)


def conv1x1_cl_to_cf(x_cl, w, b=None):
    """nn.Conv2d(Cin, Cout, 1) on a channels-last (B, N, Cin) tensor -> (B, Cout, N)."""
    B, N, Cin = x_cl.shape
    Cout = w.shape[0]
    it = jnp.dtype(x_cl.dtype).itemsize
    tile = _pick_tile(N, max(Cin, Cout), it)
    grid = (B, pl.cdiv(N, tile))
    bb = (jnp.zeros((Cout,), jnp.float32) if b is None else b.astype(jnp.float32)).reshape(Cout, 1)
    limit = _vmem_limit(tile * Cin * it, Cout * tile * it, Cout * Cin * it)
    return pl.pallas_call(
        _conv1x1_cl2cf_kernel,
        out_shape=jax.ShapeDtypeStruct((B, Cout, N), x_cl.dtype),
        grid_spec=pltpu.PrefetchScalarGridSpec(
            num_scalar_prefetch=0,
            grid=grid,
            in_specs=[
                pl.BlockSpec((1, tile, Cin), lambda bi, i: (bi, i, 0)),
                pl.BlockSpec((Cout, Cin), lambda bi, i: (0, 0)),      # resident weights
                pl.BlockSpec((Cout, 1), lambda bi, i: (0, 0)),
            ],
            out_specs=pl.BlockSpec((1, Cout, tile), lambda bi, i: (bi, 0, i)),
        ),
        compiler_params=pltpu.CompilerParams(
            dimension_semantics=("parallel", "parallel"),
            vmem_limit_bytes=limit,
        ),
    )(x_cl, w, bb)                     # weights passed in native dtype (no f32 pre-cast)


# ----------------------------------------------------------------------------
# conv_offset tail: LayerNormProxy + exact GELU + Conv2d(gc, 2, 1, bias=False), fused.
# ----------------------------------------------------------------------------
def _ln_gelu_off_kernel(x_ref, g_ref, b_ref, w_ref, o_ref):
    # x_ref: (1, C, T) tile (channels on sublanes, lane-dense spatial T).
    x = x_ref[0].astype(jnp.float32)                       # (C, T)
    mean = jnp.mean(x, axis=0, keepdims=True)
    xc = x - mean
    var = jnp.mean(xc * xc, axis=0, keepdims=True)         # biased var, like nn.LayerNorm
    y = xc * jax.lax.rsqrt(var + EPS) * g_ref[...] + b_ref[...]
    y = 0.5 * y * (1.0 + _erf(y * _SQRT_HALF))             # exact (erf) GELU epilogue
    o = jnp.dot(w_ref[...], y, preferred_element_type=jnp.float32)   # (2, T) off conv
    o_ref[0] = o.astype(o_ref.dtype)


def ln_gelu_offconv(t_nchw, gamma, beta, off_w):
    Bg, C, Hk, Wk = t_nchw.shape
    HW = Hk * Wk
    it = jnp.dtype(t_nchw.dtype).itemsize
    t3 = t_nchw.reshape(Bg, C, HW)                         # free view, no transpose
    tile = _pick_tile(HW, C, it)
    grid = (Bg, pl.cdiv(HW, tile))
    g2 = gamma.reshape(C, 1).astype(jnp.float32)
    b2 = beta.reshape(C, 1).astype(jnp.float32)
    w2 = off_w.astype(jnp.float32)                         # (2, C)
    limit = _vmem_limit(C * tile * it, 2 * tile * it)
    out = pl.pallas_call(
        _ln_gelu_off_kernel,
        out_shape=jax.ShapeDtypeStruct((Bg, 2, HW), t_nchw.dtype),
        grid_spec=pltpu.PrefetchScalarGridSpec(
            num_scalar_prefetch=0,
            grid=grid,
            in_specs=[
                pl.BlockSpec((1, C, tile), lambda b, i: (b, 0, i)),
                pl.BlockSpec((C, 1), lambda b, i: (0, 0)),
                pl.BlockSpec((C, 1), lambda b, i: (0, 0)),
                pl.BlockSpec((2, C), lambda b, i: (0, 0)),
            ],
            out_specs=pl.BlockSpec((1, 2, tile), lambda b, i: (b, 0, i)),
        ),
        compiler_params=pltpu.CompilerParams(
            dimension_semantics=("parallel", "parallel"),
            vmem_limit_bytes=limit,
        ),
    )(t3, g2, b2, w2)
    return out.reshape(Bg, 2, Hk, Wk)


# ----------------------------------------------------------------------------
# Fused proj_k / proj_v + all (query, range) attentions for all heads, one call.
# ----------------------------------------------------------------------------
def _ranged_attention_kernel(xs_ref, q_ref, wk_ref, bk_ref, wv_ref, bv_ref,
                             pool_ref, poolt_ref, o_ref, k_vmem, v_vmem,
                             *, scale, ranges):
    xs = xs_ref[0]                                         # (n, C) channels-last, native dtype
    # proj_k / proj_v fused: contract over channels (last dim of both operands) on
    # the MXU, so K/V come out channels-first without any explicit transpose.
    k_vmem[...] = jax.lax.dot_general(wk_ref[...], xs, (((1,), (1,)), ((), ())),
                                      preferred_element_type=jnp.float32) + bk_ref[...]
    v_vmem[...] = jax.lax.dot_general(wv_ref[...], xs, (((1,), (1,)), ((), ())),
                                      preferred_element_type=jnp.float32) + bv_ref[...]
    pool = pool_ref[...]                                   # (n_heads, C) 0/1 head-pool matrix
    pool_t = poolt_ref[...]                                # (C, n_heads)
    for r, (s0, ln) in enumerate(ranges):                  # static unroll over sample ranges
        qr = q_ref[0, :, r:r + 1].astype(jnp.float32)      # (C, 1)
        kr = k_vmem[:, s0:s0 + ln]                         # (C, ln), resident in VMEM
        vr = v_vmem[:, s0:s0 + ln]
        s = jnp.dot(pool, qr * kr, preferred_element_type=jnp.float32) * scale   # (H, ln)
        s = s - jnp.max(s, axis=-1, keepdims=True)
        p = jnp.exp(s)
        p = p * pl.reciprocal(jnp.sum(p, axis=-1, keepdims=True), approx=False)
        pe = jnp.dot(pool_t, p, preferred_element_type=jnp.float32)              # (C, ln)
        o = jnp.sum(vr * pe, axis=-1, keepdims=True)                             # (C, 1)
        o_ref[0, :, r:r + 1] = o.astype(o_ref.dtype)


def ranged_attention(xs_cl, q_sel, wk, bk, wv, bv, *, n_heads, n_head_channels,
                     scale, ranges):
    """xs_cl: (B, n, C) channels-last samples; q_sel: (B, C, NR) projected queries.
    ranges: static list of (query_idx, start, length).  Returns (B, C, NR)."""
    B, n, C = xs_cl.shape
    NR = len(ranges)
    hc = n_head_channels
    pool = (jnp.arange(C)[None, :] // hc == jnp.arange(n_heads)[:, None]).astype(jnp.float32)
    it = jnp.dtype(xs_cl.dtype).itemsize
    limit = _vmem_limit(n * C * it, C * NR * it, 2 * C * n * 4, 2 * C * C * it)
    kern = functools.partial(
        _ranged_attention_kernel, scale=scale,
        ranges=tuple((int(s0), int(ln)) for _, s0, ln in ranges))
    return pl.pallas_call(
        kern,
        out_shape=jax.ShapeDtypeStruct((B, C, NR), xs_cl.dtype),
        grid_spec=pltpu.PrefetchScalarGridSpec(
            num_scalar_prefetch=0,
            grid=(B,),
            in_specs=[
                pl.BlockSpec((1, n, C), lambda b: (b, 0, 0)),
                pl.BlockSpec((1, C, NR), lambda b: (b, 0, 0)),
                pl.BlockSpec((C, C), lambda b: (0, 0)),
                pl.BlockSpec((C, 1), lambda b: (0, 0)),
                pl.BlockSpec((C, C), lambda b: (0, 0)),
                pl.BlockSpec((C, 1), lambda b: (0, 0)),
                pl.BlockSpec((n_heads, C), lambda b: (0, 0)),
                pl.BlockSpec((C, n_heads), lambda b: (0, 0)),
            ],
            out_specs=pl.BlockSpec((1, C, NR), lambda b: (b, 0, 0)),
            scratch_shapes=[pltpu.VMEM((C, n), jnp.float32),
                            pltpu.VMEM((C, n), jnp.float32)],
        ),
        compiler_params=pltpu.CompilerParams(
            dimension_semantics=("parallel",),
            vmem_limit_bytes=limit,
        ),
    )(xs_cl, q_sel, wk, bk.reshape(C, 1).astype(jnp.float32),
      wv, bv.reshape(C, 1).astype(jnp.float32), pool, pool.T)


# ----------------------------------------------------------------------------
# XLA glue shared by the Pallas path and the reference.
# ----------------------------------------------------------------------------
def depthwise_conv3x3(x, w, b, stride=1):
    # TODO(synk): depthwise 3x3 conv kept as an XLA conv (no clean Pallas win here).
    gc = x.shape[1]
    y = jax.lax.conv_general_dilated(
        x, w, window_strides=(stride, stride), padding=((1, 1), (1, 1)),
        dimension_numbers=("NCHW", "OIHW", "NCHW"), feature_group_count=gc)
    return y + b.reshape(1, gc, 1, 1)


def get_ref_points(Hk, Wk, B, n_groups, dtype):
    ref_y = jnp.linspace(0.5, Hk - 0.5, Hk, dtype=dtype)
    ref_x = jnp.linspace(0.5, Wk - 0.5, Wk, dtype=dtype)
    ry, rx = jnp.meshgrid(ref_y, ref_x, indexing="ij")
    ref = jnp.stack((ry, rx), axis=-1)                    # (..., (y, x))
    ref = ref.at[..., 1].set(ref[..., 1] / Wk * 2.0 - 1.0)
    ref = ref.at[..., 0].set(ref[..., 0] / Hk * 2.0 - 1.0)
    return jnp.broadcast_to(ref[None], (B * n_groups, Hk, Wk, 2))


def grid_sample_bilinear_cl(x_cl, H, W, grid):
    """F.grid_sample(bilinear, zeros, align_corners=True) on a channels-last input.
    x_cl: (N, H*W, C); grid: (N, Hg, Wg, 2) in (x, y) order.  Returns (N, Hg*Wg, C)."""
    # TODO(synk): data-dependent bilinear gather left as XLA gather glue; verify
    # align_corners semantics against the torch module directly.
    N, HW, C = x_cl.shape
    Hg, Wg = grid.shape[1], grid.shape[2]
    gx, gy = grid[..., 0], grid[..., 1]
    ix = (gx + 1.0) * 0.5 * (W - 1)
    iy = (gy + 1.0) * 0.5 * (H - 1)
    ix0, iy0 = jnp.floor(ix), jnp.floor(iy)
    ix1, iy1 = ix0 + 1.0, iy0 + 1.0
    wx1, wy1 = ix - ix0, iy - iy0
    wx0, wy0 = 1.0 - wx1, 1.0 - wy1

    def gather(iy_, ix_):
        valid = (ix_ >= 0) & (ix_ <= W - 1) & (iy_ >= 0) & (iy_ <= H - 1)
        ixc = jnp.clip(ix_, 0, W - 1).astype(jnp.int32)
        iyc = jnp.clip(iy_, 0, H - 1).astype(jnp.int32)
        idx = (iyc * W + ixc).reshape(N, Hg * Wg, 1)
        g = jnp.take_along_axis(x_cl, jnp.broadcast_to(idx, (N, Hg * Wg, C)), axis=1)
        return g * valid.reshape(N, Hg * Wg, 1).astype(x_cl.dtype)

    def wgt(a):
        return a.reshape(N, Hg * Wg, 1)

    return (gather(iy0, ix0) * wgt(wy0 * wx0) + gather(iy0, ix1) * wgt(wy0 * wx1)
            + gather(iy1, ix0) * wgt(wy1 * wx0) + gather(iy1, ix1) * wgt(wy1 * wx1))


def grid_sample_bilinear(x, grid):
    """NCHW variant (used by the pure-JAX reference)."""
    N, C, H, W = x.shape
    Hg, Wg = grid.shape[1], grid.shape[2]
    gx, gy = grid[..., 0], grid[..., 1]
    ix = (gx + 1.0) * 0.5 * (W - 1)
    iy = (gy + 1.0) * 0.5 * (H - 1)
    ix0, iy0 = jnp.floor(ix), jnp.floor(iy)
    ix1, iy1 = ix0 + 1.0, iy0 + 1.0
    wx1, wy1 = ix - ix0, iy - iy0
    wx0, wy0 = 1.0 - wx1, 1.0 - wy1
    flat = x.reshape(N, C, H * W)

    def gather(iy_, ix_):
        valid = (ix_ >= 0) & (ix_ <= W - 1) & (iy_ >= 0) & (iy_ <= H - 1)
        ixc = jnp.clip(ix_, 0, W - 1).astype(jnp.int32)
        iyc = jnp.clip(iy_, 0, H - 1).astype(jnp.int32)
        idx = jnp.broadcast_to((iyc * W + ixc).reshape(N, 1, Hg * Wg), (N, C, Hg * Wg))
        g = jnp.take_along_axis(flat, idx, axis=2).reshape(N, C, Hg, Wg)
        return g * valid.reshape(N, 1, Hg, Wg).astype(x.dtype)

    return (gather(iy0, ix0) * (wy0 * wx0).reshape(N, 1, Hg, Wg)
            + gather(iy0, ix1) * (wy0 * wx1).reshape(N, 1, Hg, Wg)
            + gather(iy1, ix0) * (wy1 * wx0).reshape(N, 1, Hg, Wg)
            + gather(iy1, ix1) * (wy1 * wx1).reshape(N, 1, Hg, Wg))


# ----------------------------------------------------------------------------
# PDAttention.forward (Pallas-accelerated).
# ----------------------------------------------------------------------------
def pd_attention_forward(params, q, x, H, W, *, n_heads, n_head_channels,
                         n_groups=1, ra_type="gar", offset_range_factor=None,
                         stride=1, no_off=False):
    B, HW, C = x.shape
    _, NQ, _ = q.shape
    nc = n_heads * n_head_channels
    gc = nc // n_groups
    scale = n_head_channels ** -0.5

    # --- offset branch: proj_offset (transpose fused) -> dwconv -> LN+GELU+off (fused)
    offset_proj = conv1x1_cl_to_cf(x, params["proj_offset_w"], params["proj_offset_b"])
    offset_proj = offset_proj.reshape(B * n_groups, gc, H, W)       # 'b (g c) h w -> (b g) c h w'
    t = depthwise_conv3x3(offset_proj, params["dw_w"], params["dw_b"], stride)
    offset = ln_gelu_offconv(t, params["ln_g"], params["ln_b"], params["off_w"])  # (B*g, 2, Hk, Wk)

    Hk, Wk = offset.shape[2], offset.shape[3]
    n_sample = Hk * Wk
    if offset_range_factor is not None:
        orange = jnp.array([offset_range_factor[0] / Hk, offset_range_factor[1] / Wk],
                           dtype=offset.dtype).reshape(1, 2, 1, 1)
        offset = jnp.tanh(offset) * orange
    offset = jnp.transpose(offset, (0, 2, 3, 1))                    # 'b p h w -> b h w p'
    reference = get_ref_points(Hk, Wk, B, n_groups, x.dtype)
    if no_off:
        offset = jnp.zeros_like(offset)
    pos = offset + reference if offset_range_factor is not None else jnp.tanh(offset + reference)

    # --- deformable sampling on the channels-last input (no NCHW x is materialized)
    if n_groups == 1:
        x_cl_g = x
    else:
        x_cl_g = x.reshape(B, HW, n_groups, gc).transpose(0, 2, 1, 3).reshape(B * n_groups, HW, gc)
    xs = grid_sample_bilinear_cl(x_cl_g, H, W, pos[..., ::-1])      # (B*g, n_sample, gc)
    if n_groups == 1:
        xs_flat = xs                                                # (B, n_sample, C)
    else:
        xs_flat = xs.reshape(B, n_groups, n_sample, gc).transpose(0, 2, 1, 3).reshape(B, n_sample, C)

    # --- static (query, sample-range) schedule
    if ra_type == "gar":
        ranges = [(0, 0, n_sample)]                                 # q0 attends over all samples
        for j in range(min(NQ - 1, (Hk + 1) // 2)):                 # torch.split(x, 2, dim=-2)
            rows = min(2, Hk - 2 * j)
            ranges.append((1 + j, 2 * j * Wk, rows * Wk))
    elif ra_type == "g":
        ranges = [(i, 0, n_sample) for i in range(NQ)]
    else:
        # TODO(synk): ra_type in {'ggar', 'r', 'garr'} not implemented.
        raise NotImplementedError(f"ra_type={ra_type!r}")

    # --- proj_q + query gather: tiny lane widths -> XLA einsum (review item).
    q_proj = jnp.einsum("bqc,oc->bqo", q, params["proj_q_w"]) + params["proj_q_b"]
    q_idx = jnp.array([r[0] for r in ranges], dtype=jnp.int32)
    q_sel = jnp.transpose(q_proj[:, q_idx, :], (0, 2, 1))           # (B, C, NR)

    # --- fused proj_k/proj_v + all ranges + all heads in one pallas_call
    attn = ranged_attention(xs_flat, q_sel, params["proj_k_w"], params["proj_k_b"],
                            params["proj_v_w"], params["proj_v_b"],
                            n_heads=n_heads, n_head_channels=n_head_channels,
                            scale=scale, ranges=ranges)             # (B, C, NR)

    # --- proj_out (NR lanes, tiny) -> XLA; attn_drop/proj_drop are identity (p=0.0).
    y = jnp.einsum("oc,bcr->bor", params["proj_out_w"], attn) + params["proj_out_b"][None, :, None]
    return [jnp.transpose(y[:, :, r:r + 1], (0, 2, 1)) for r in range(len(ranges))]


# ----------------------------------------------------------------------------
# Pure-JAX reference mirroring the PyTorch module step by step.
# ----------------------------------------------------------------------------
def _ref_layer_norm_proxy(x, g, b):
    xt = jnp.transpose(x, (0, 2, 3, 1)).astype(jnp.float32)
    mean = xt.mean(-1, keepdims=True)
    var = ((xt - mean) ** 2).mean(-1, keepdims=True)
    y = (xt - mean) * jax.lax.rsqrt(var + EPS) * g + b
    return jnp.transpose(y, (0, 3, 1, 2)).astype(x.dtype)


def _ref_conv1x1(x, w, b=None):
    y = jnp.einsum("oc,bchw->bohw", w, x)
    return y if b is None else y + b.reshape(1, -1, 1, 1)


def _ref_attn_single(params, q1, xs, n_heads, hc, scale):
    B, _, C = q1.shape
    qq = jnp.transpose(q1, (0, 2, 1)).reshape(B, C, 1, 1)
    xx = xs.reshape(B, C, 1, -1)
    qq = _ref_conv1x1(qq, params["proj_q_w"], params["proj_q_b"]).reshape(B * n_heads, hc, 1)
    kk = _ref_conv1x1(xx, params["proj_k_w"], params["proj_k_b"]).reshape(B * n_heads, hc, -1)
    vv = _ref_conv1x1(xx, params["proj_v_w"], params["proj_v_b"]).reshape(B * n_heads, hc, -1)
    attn = jnp.einsum("bcm,bcn->bmn", qq, kk) * scale
    attn = jax.nn.softmax(attn, axis=2)
    out = jnp.einsum("bmn,bcn->bcm", attn, vv).reshape(B, C, 1, 1)
    y = _ref_conv1x1(out, params["proj_out_w"], params["proj_out_b"])
    return jnp.transpose(y.reshape(B, C, -1), (0, 2, 1))


def pd_attention_reference(params, q, x, H, W, *, n_heads, n_head_channels, n_groups=1):
    B, HW, C = x.shape
    _, NQ, _ = q.shape
    gc = (n_heads * n_head_channels) // n_groups
    scale = n_head_channels ** -0.5
    x_nchw = jnp.transpose(x, (0, 2, 1)).reshape(B, C, H, W)
    op = _ref_conv1x1(x_nchw, params["proj_offset_w"], params["proj_offset_b"])
    op = op.reshape(B * n_groups, gc, H, W)
    t = depthwise_conv3x3(op, params["dw_w"], params["dw_b"], 1)
    t = _ref_layer_norm_proxy(t, params["ln_g"], params["ln_b"])
    t = jax.nn.gelu(t, approximate=False)
    offset = _ref_conv1x1(t, params["off_w"], None)
    Hk, Wk = offset.shape[2], offset.shape[3]
    offset = jnp.transpose(offset, (0, 2, 3, 1))
    reference = get_ref_points(Hk, Wk, B, n_groups, x.dtype)
    pos = jnp.tanh(offset + reference)
    x_sampled = grid_sample_bilinear(x_nchw.reshape(B * n_groups, gc, H, W), pos[..., ::-1])

    qs = [q[:, i:i + 1, :] for i in range(NQ)]                      # ra_type == 'gar'
    y = [_ref_attn_single(params, qs[0], x_sampled, n_heads, n_head_channels, scale)]
    splits = [x_sampled[:, :, j:j + 2, :] for j in range(0, Hk, 2)]
    for _q, _x in zip(qs[1:], splits):
        y.append(_ref_attn_single(params, _q, _x, n_heads, n_head_channels, scale))
    return y


if __name__ == "__main__":
    B, NQ = 2, 5
    N_HEADS, HC = 2, 4
    NC = N_HEADS * HC            # 8 channels
    N_GROUPS, GC = 1, NC
    H = W = 8
    HW = H * W

    key = jax.random.PRNGKey(0)
    ks = jax.random.split(key, 17)
    nrm = lambda k, shape, s=0.2: s * jax.random.normal(k, shape, dtype=jnp.float32)
    params = {
        "proj_offset_w": nrm(ks[0], (NC, NC)), "proj_offset_b": nrm(ks[1], (NC,), 0.1),
        "dw_w": nrm(ks[2], (GC, 1, 3, 3)),     "dw_b": nrm(ks[3], (GC,), 0.1),
        "ln_g": 1.0 + nrm(ks[4], (GC,), 0.1),  "ln_b": nrm(ks[5], (GC,), 0.1),
        "off_w": nrm(ks[6], (2, GC)),
        "proj_q_w": nrm(ks[7], (NC, NC)),  "proj_q_b": nrm(ks[8], (NC,), 0.1),
        "proj_k_w": nrm(ks[9], (NC, NC)),  "proj_k_b": nrm(ks[10], (NC,), 0.1),
        "proj_v_w": nrm(ks[11], (NC, NC)), "proj_v_b": nrm(ks[12], (NC,), 0.1),
        "proj_out_w": nrm(ks[13], (NC, NC)), "proj_out_b": nrm(ks[14], (NC,), 0.1),
    }
    q = jax.random.normal(ks[15], (B, NQ, NC), dtype=jnp.float32)
    x = jax.random.normal(ks[16], (B, HW, NC), dtype=jnp.float32)

    fwd = jax.jit(
        functools.partial(pd_attention_forward, n_heads=N_HEADS, n_head_channels=HC,
                          n_groups=N_GROUPS, ra_type="gar", offset_range_factor=None,
                          stride=1, no_off=False),
        static_argnums=(3, 4))
    ys = fwd(params, q, x, H, W)
    ys = jax.block_until_ready(jnp.stack(ys))                       # (num_queries, B, 1, C)

    ys_ref = jnp.stack(pd_attention_reference(params, q, x, H, W, n_heads=N_HEADS,
                                              n_head_channels=HC, n_groups=N_GROUPS))
    assert ys.shape == (NQ, B, 1, NC), ys.shape
    err = float(jnp.max(jnp.abs(ys - ys_ref)))
    assert jnp.allclose(ys, ys_ref, atol=1e-4, rtol=1e-4), err
    print("KERNEL_OK")
</pallas_src>

<mosaic_0001>
module attributes {stable_mosaic.version = 11 : i64} {
  func.func @_conv1x1_cl2cf_kernel(%arg0: i32, %arg1: i32, %arg2: memref<1x64x8xf32, #tpu.memory_space<vmem>>, %arg3: memref<8x8xf32, #tpu.memory_space<vmem>>, %arg4: memref<8x1xf32, #tpu.memory_space<vmem>>, %arg5: memref<1x8x64xf32, #tpu.memory_space<vmem>>) attributes {dimension_semantics = [#tpu.dimension_semantics<parallel>, #tpu.dimension_semantics<parallel>], iteration_bounds = array<i64: 2, 1>, scalar_prefetch = 0 : i64, scratch_operands = 0 : i64, tpu.core_type = #tpu.core_type<tc>, window_params = [{transform_indices = @transform_0, window_bounds = array<i64: 1, 64, 8>}, {pipeline_mode = #tpu.pipeline_mode<synchronous>, transform_indices = @transform_1, window_bounds = array<i64: 8, 8>}, {pipeline_mode = #tpu.pipeline_mode<synchronous>, transform_indices = @transform_2, window_bounds = array<i64: 8, 1>}, {transform_indices = @transform_3, window_bounds = array<i64: 1, 8, 64>}]} {
    %c0 = arith.constant 0 : index
    %c0_0 = arith.constant 0 : index
    %0 = vector.load %arg3[%c0, %c0_0] : memref<8x8xf32, #tpu.memory_space<vmem>>, vector<8x8xf32>
    %c0_1 = arith.constant 0 : index
    %c0_2 = arith.constant 0 : index
    %c0_3 = arith.constant 0 : index
    %1 = vector.load %arg2[%c0_1, %c0_2, %c0_3] : memref<1x64x8xf32, #tpu.memory_space<vmem>>, vector<1x64x8xf32>
    %2 = vector.shape_cast %1 : vector<1x64x8xf32> to vector<64x8xf32>
    %cst = arith.constant dense<0.000000e+00> : vector<8x64xf32>
    %3 = tpu.matmul %0, %2, %cst {dimension_numbers = #tpu.dot_dimension_numbers<[1], [1], [0], [0], [0, 0, 1, 0], [], []>} : vector<8x8xf32>, vector<64x8xf32>, vector<8x64xf32> -> vector<8x64xf32>
    %c0_4 = arith.constant 0 : index
    %c0_5 = arith.constant 0 : index
    %4 = vector.load %arg4[%c0_4, %c0_5] : memref<8x1xf32, #tpu.memory_space<vmem>>, vector<8x1xf32>
    %5 = vector.broadcast %4 : vector<8x1xf32> to vector<8x64xf32>
    %6 = arith.addf %3, %5 : vector<8x64xf32>
    %c0_6 = arith.constant 0 : index
    %c0_7 = arith.constant 0 : index
    %c0_8 = arith.constant 0 : index
    %7 = vector.load %arg5[%c0_6, %c0_7, %c0_8] : memref<1x8x64xf32, #tpu.memory_space<vmem>>, vector<1x8x64xf32>
    %8 = vector.shape_cast %7 : vector<1x8x64xf32> to vector<8x64xf32>
    %9 = vector.shape_cast %6 : vector<8x64xf32> to vector<1x8x64xf32>
    tpu.vector_store %arg5[%c0_6, %c0_7, %c0_8], %9 {strides = array<i32>} : memref<1x8x64xf32, #tpu.memory_space<vmem>>, vector<1x8x64xf32>,
    return
  }
  func.func @transform_0(%arg0: i32, %arg1: i32) -> (i32, i32, i32) {
    %c0_i32 = arith.constant 0 : i32
    %c0_i32_0 = arith.constant 0 : i32
    return %arg0, %arg1, %c0_i32 : i32, i32, i32
  }
  func.func @transform_1(%arg0: i32, %arg1: i32) -> (i32, i32) {
    %c0_i32 = arith.constant 0 : i32
    %c0_i32_0 = arith.constant 0 : i32
    %c0_i32_1 = arith.constant 0 : i32
    return %c0_i32, %c0_i32_0 : i32, i32
  }
  func.func @transform_2(%arg0: i32, %arg1: i32) -> (i32, i32) {
    %c0_i32 = arith.constant 0 : i32
    %c0_i32_0 = arith.constant 0 : i32
    %c0_i32_1 = arith.constant 0 : i32
    return %c0_i32, %c0_i32_0 : i32, i32
  }
  func.func @transform_3(%arg0: i32, %arg1: i32) -> (i32, i32, i32) {
    %c0_i32 = arith.constant 0 : i32
    %c0_i32_0 = arith.constant 0 : i32
    return %arg0, %c0_i32, %arg1 : i32, i32, i32
  }
}

module attributes {stable_mosaic.version = 11 : i64} {
  func.func @_ln_gelu_off_kernel(%arg0: i32, %arg1: i32, %arg2: memref<1x8x64xf32, #tpu.memory_space<vmem>>, %arg3: memref<8x1xf32, #tpu.memory_space<vmem>>, %arg4: memref<8x1xf32, #tpu.memory_space<vmem>>, %arg5: memref<2x8xf32, #tpu.memory_space<vmem>>, %arg6: memref<1x2x64xf32, #tpu.memory_space<vmem>>) attributes {dimension_semantics = [#tpu.dimension_semantics<parallel>, #tpu.dimension_semantics<parallel>], iteration_bounds = array<i64: 2, 1>, scalar_prefetch = 0 : i64, scratch_operands = 0 : i64, tpu.core_type = #tpu.core_type<tc>, window_params = [{transform_indices = @transform_0, window_bounds = array<i64: 1, 8, 64>}, {pipeline_mode = #tpu.pipeline_mode<synchronous>, transform_indices = @transform_1, window_bounds = array<i64: 8, 1>}, {pipeline_mode = #tpu.pipeline_mode<synchronous>, transform_indices = @transform_2, window_bounds = array<i64: 8, 1>}, {pipeline_mode = #tpu.pipeline_mode<synchronous>, transform_indices = @transform_3, window_bounds = array<i64: 2, 8>}, {transform_indices = @transform_4, window_bounds = array<i64: 1, 2, 64>}]} {
    %c0 = arith.constant 0 : index
    %c0_0 = arith.constant 0 : index
    %c0_1 = arith.constant 0 : index
    %0 = vector.load %arg2[%c0, %c0_0, %c0_1] : memref<1x8x64xf32, #tpu.memory_space<vmem>>, vector<1x8x64xf32>
    %1 = vector.shape_cast %0 : vector<1x8x64xf32> to vector<8x64xf32>
    %cst = arith.constant dense<0.000000e+00> : vector<64xf32>
    %2 = vector.multi_reduction <add>, %1, %cst [0] : vector<8x64xf32> to vector<64xf32>
    %3 = vector.shape_cast %2 : vector<64xf32> to vector<1x64xf32>
    %cst_2 = arith.constant 8.000000e+00 : f32
    %4 = vector.broadcast %cst_2 : f32 to vector<1x64xf32>
    %5 = arith.divf %3, %4 : vector<1x64xf32>
    %6 = vector.broadcast %5 : vector<1x64xf32> to vector<8x64xf32>
    %7 = arith.subf %1, %6 : vector<8x64xf32>
    %8 = arith.mulf %7, %7 : vector<8x64xf32>
    %cst_3 = arith.constant dense<0.000000e+00> : vector<64xf32>
    %9 = vector.multi_reduction <add>, %8, %cst_3 [0] : vector<8x64xf32> to vector<64xf32>
    %10 = vector.shape_cast %9 : vector<64xf32> to vector<1x64xf32>
    %cst_4 = arith.constant 8.000000e+00 : f32
    %11 = vector.broadcast %cst_4 : f32 to vector<1x64xf32>
    %12 = arith.divf %10, %11 : vector<1x64xf32>
    %cst_5 = arith.constant 9.99999974E-6 : f32
    %13 = vector.broadcast %cst_5 : f32 to vector<1x64xf32>
    %14 = arith.addf %12, %13 : vector<1x64xf32>
    %15 = math.rsqrt %14 : vector<1x64xf32>
    %16 = vector.broadcast %15 : vector<1x64xf32> to vector<8x64xf32>
    %17 = arith.mulf %7, %16 : vector<8x64xf32>
    %c0_6 = arith.constant 0 : index
    %c0_7 = arith.constant 0 : index
    %18 = vector.load %arg3[%c0_6, %c0_7] : memref<8x1xf32, #tpu.memory_space<vmem>>, vector<8x1xf32>
    %19 = vector.broadcast %18 : vector<8x1xf32> to vector<8x64xf32>
    %20 = arith.mulf %17, %19 : vector<8x64xf32>
    %c0_8 = arith.constant 0 : index
    %c0_9 = arith.constant 0 : index
    %21 = vector.load %arg4[%c0_8, %c0_9] : memref<8x1xf32, #tpu.memory_space<vmem>>, vector<8x1xf32>
    %22 = vector.broadcast %21 : vector<8x1xf32> to vector<8x64xf32>
    %23 = arith.addf %20, %22 : vector<8x64xf32>
    %cst_10 = arith.constant 5.000000e-01 : f32
    %24 = vector.broadcast %cst_10 : f32 to vector<8x64xf32>
    %25 = arith.mulf %24, %23 : vector<8x64xf32>
    %cst_11 = arith.constant 0.707106769 : f32
    %26 = vector.broadcast %cst_11 : f32 to vector<8x64xf32>
    %27 = arith.mulf %23, %26 : vector<8x64xf32>
    %28 = math.absf %27 : vector<8x64xf32>
    %cst_12 = arith.constant 0.327591091 : f32
    %29 = vector.broadcast %cst_12 : f32 to vector<8x64xf32>
    %30 = arith.mulf %29, %28 : vector<8x64xf32>
    %cst_13 = arith.constant 1.000000e+00 : f32
    %31 = vector.broadcast %cst_13 : f32 to vector<8x64xf32>
    %32 = arith.addf %31, %30 : vector<8x64xf32>
    %cst_14 = arith.constant 1.000000e+00 : f32
    %33 = vector.broadcast %cst_14 : f32 to vector<8x64xf32>
    %34 = arith.divf %33, %32 : vector<8x64xf32>
    %cst_15 = arith.constant 1.06140542 : f32
    %35 = vector.broadcast %cst_15 : f32 to vector<8x64xf32>
    %36 = arith.mulf %35, %34 : vector<8x64xf32>
    %cst_16 = arith.constant -1.45315206 : f32
    %37 = vector.broadcast %cst_16 : f32 to vector<8x64xf32>
    %38 = arith.addf %36, %37 : vector<8x64xf32>
    %39 = arith.mulf %38, %34 : vector<8x64xf32>
    %cst_17 = arith.constant 1.42141378 : f32
    %40 = vector.broadcast %cst_17 : f32 to vector<8x64xf32>
    %41 = arith.addf %39, %40 : vector<8x64xf32>
    %42 = arith.mulf %41, %34 : vector<8x64xf32>
    %cst_18 = arith.constant -0.284496725 : f32
    %43 = vector.broadcast %cst_18 : f32 to vector<8x64xf32>
    %44 = arith.addf %42, %43 : vector<8x64xf32>
    %45 = arith.mulf %44, %34 : vector<8x64xf32>
    %cst_19 = arith.constant 0.254829586 : f32
    %46 = vector.broadcast %cst_19 : f32 to vector<8x64xf32>
    %47 = arith.addf %45, %46 : vector<8x64xf32>
    %48 = arith.mulf %47, %34 : vector<8x64xf32>
    %cst_20 = arith.constant 0.000000e+00 : f32
    %49 = vector.broadcast %cst_20 : f32 to vector<8x64xf32>
    %50 = arith.subf %49, %28 : vector<8x64xf32>
    %51 = arith.mulf %50, %28 : vector<8x64xf32>
    %52 = math.exp %51 : vector<8x64xf32>
    %53 = arith.mulf %48, %52 : vector<8x64xf32>
    %cst_21 = arith.constant 1.000000e+00 : f32
    %54 = vector.broadcast %cst_21 : f32 to vector<8x64xf32>
    %55 = arith.subf %54, %53 : vector<8x64xf32>
    %cst_22 = arith.constant 0.000000e+00 : f32
    %56 = vector.broadcast %cst_22 : f32 to vector<8x64xf32>
    %57 = arith.cmpf olt, %27, %56 : vector<8x64xf32>
    %cst_23 = arith.constant 0.000000e+00 : f32
    %58 = vector.broadcast %cst_23 : f32 to vector<8x64xf32>
    %59 = arith.subf %58, %55 : vector<8x64xf32>
    %60 = arith.select %57, %59, %55 : vector<8x64xi1>, vector<8x64xf32>
    %cst_24 = arith.constant 1.000000e+00 : f32
    %61 = vector.broadcast %cst_24 : f32 to vector<8x64xf32>
    %62 = arith.addf %61, %60 : vector<8x64xf32>
    %63 = arith.mulf %25, %62 : vector<8x64xf32>
    %c0_25 = arith.constant 0 : index
    %c0_26 = arith.constant 0 : index
    %64 = vector.load %arg5[%c0_25, %c0_26] : memref<2x8xf32, #tpu.memory_space<vmem>>, vector<2x8xf32>
    %cst_27 = arith.constant dense<0.000000e+00> : vector<2x64xf32>
    %65 = tpu.matmul %64, %63, %cst_27 {dimension_numbers = #tpu.dot_dimension_numbers<[1], [0], [0], [1], [0, 0, 1, 1], [], []>} : vector<2x8xf32>, vector<8x64xf32>, vector<2x64xf32> -> vector<2x64xf32>
    %c0_28 = arith.constant 0 : index
    %c0_29 = arith.constant 0 : index
    %c0_30 = arith.constant 0 : index
    %66 = vector.load %arg6[%c0_28, %c0_29, %c0_30] : memref<1x2x64xf32, #tpu.memory_space<vmem>>, vector<1x2x64xf32>
    %67 = vector.shape_cast %66 : vector<1x2x64xf32> to vector<2x64xf32>
    %68 = vector.shape_cast %65 : vector<2x64xf32> to vector<1x2x64xf32>
    tpu.vector_store %arg6[%c0_28, %c0_29, %c0_30], %68 {strides = array<i32>} : memref<1x2x64xf32, #tpu.memory_space<vmem>>, vector<1x2x64xf32>,
    return
  }
  func.func @transform_0(%arg0: i32, %arg1: i32) -> (i32, i32, i32) {
    %c0_i32 = arith.constant 0 : i32
    %c0_i32_0 = arith.constant 0 : i32
    return %arg0, %c0_i32, %arg1 : i32, i32, i32
  }
  func.func @transform_1(%arg0: i32, %arg1: i32) -> (i32, i32) {
    %c0_i32 = arith.constant 0 : i32
    %c0_i32_0 = arith.constant 0 : i32
    %c0_i32_1 = arith.constant 0 : i32
    return %c0_i32, %c0_i32_0 : i32, i32
  }
  func.func @transform_2(%arg0: i32, %arg1: i32) -> (i32, i32) {
    %c0_i32 = arith.constant 0 : i32
    %c0_i32_0 = arith.constant 0 : i32
    %c0_i32_1 = arith.constant 0 : i32
    return %c0_i32, %c0_i32_0 : i32, i32
  }
  func.func @transform_3(%arg0: i32, %arg1: i32) -> (i32, i32) {
    %c0_i32 = arith.constant 0 : i32
    %c0_i32_0 = arith.constant 0 : i32
    %c0_i32_1 = arith.constant 0 : i32
    return %c0_i32, %c0_i32_0 : i32, i32
  }
  func.func @transform_4(%arg0: i32, %arg1: i32) -> (i32, i32, i32) {
    %c0_i32 = arith.constant 0 : i32
    %c0_i32_0 = arith.constant 0 : i32
    return %arg0, %c0_i32, %arg1 : i32, i32, i32
  }
}

module attributes {stable_mosaic.version = 11 : i64} {
  func.func @_ranged_attention_kernel(%arg0: i32, %arg1: memref<1x64x8xf32, #tpu.memory_space<vmem>>, %arg2: memref<1x8x5xf32, #tpu.memory_space<vmem>>, %arg3: memref<8x8xf32, #tpu.memory_space<vmem>>, %arg4: memref<8x1xf32, #tpu.memory_space<vmem>>, %arg5: memref<8x8xf32, #tpu.memory_space<vmem>>, %arg6: memref<8x1xf32, #tpu.memory_space<vmem>>, %arg7: memref<2x8xf32, #tpu.memory_space<vmem>>, %arg8: memref<8x2xf32, #tpu.memory_space<vmem>>, %arg9: memref<1x8x5xf32, #tpu.memory_space<vmem>>, %arg10: memref<8x64xf32, #tpu.memory_space<vmem>>, %arg11: memref<8x64xf32, #tpu.memory_space<vmem>>) attributes {dimension_semantics = [#tpu.dimension_semantics<parallel>], iteration_bounds = array<i64: 2>, scalar_prefetch = 0 : i64, scratch_operands = 2 : i64, tpu.core_type = #tpu.core_type<tc>, window_params = [{transform_indices = @transform_0, window_bounds = array<i64: 1, 64, 8>}, {transform_indices = @transform_1, window_bounds = array<i64: 1, 8, 5>}, {pipeline_mode = #tpu.pipeline_mode<synchronous>, transform_indices = @transform_2, window_bounds = array<i64: 8, 8>}, {pipeline_mode = #tpu.pipeline_mode<synchronous>, transform_indices = @transform_3, window_bounds = array<i64: 8, 1>}, {pipeline_mode = #tpu.pipeline_mode<synchronous>, transform_indices = @transform_4, window_bounds = array<i64: 8, 8>}, {pipeline_mode = #tpu.pipeline_mode<synchronous>, transform_indices = @transform_5, window_bounds = array<i64: 8, 1>}, {pipeline_mode = #tpu.pipeline_mode<synchronous>, transform_indices = @transform_6, window_bounds = array<i64: 2, 8>}, {pipeline_mode = #tpu.pipeline_mode<synchronous>, transform_indices = @transform_7, window_bounds = array<i64: 8, 2>}, {transform_indices = @transform_8, window_bounds = array<i64: 1, 8, 5>}]} {
    %c0 = arith.constant 0 : index
    %c0_0 = arith.constant 0 : index
    %c0_1 = arith.constant 0 : index
    %0 = vector.load %arg1[%c0, %c0_0, %c0_1] : memref<1x64x8xf32, #tpu.memory_space<vmem>>, vector<1x64x8xf32>
    %1 = vector.shape_cast %0 : vector<1x64x8xf32> to vector<64x8xf32>
    %c0_2 = arith.constant 0 : index
    %c0_3 = arith.constant 0 : index
    %2 = vector.load %arg3[%c0_2, %c0_3] : memref<8x8xf32, #tpu.memory_space<vmem>>, vector<8x8xf32>
    %cst = arith.constant dense<0.000000e+00> : vector<8x64xf32>
    %3 = tpu.matmul %2, %1, %cst {dimension_numbers = #tpu.dot_dimension_numbers<[1], [1], [0], [0], [0, 0, 1, 0], [], []>} : vector<8x8xf32>, vector<64x8xf32>, vector<8x64xf32> -> vector<8x64xf32>
    %c0_4 = arith.constant 0 : index
    %c0_5 = arith.constant 0 : index
    %4 = vector.load %arg4[%c0_4, %c0_5] : memref<8x1xf32, #tpu.memory_space<vmem>>, vector<8x1xf32>
    %5 = vector.broadcast %4 : vector<8x1xf32> to vector<8x64xf32>
    %6 = arith.addf %3, %5 : vector<8x64xf32>
    %c0_6 = arith.constant 0 : index
    %c0_7 = arith.constant 0 : index
    %7 = vector.load %arg10[%c0_6, %c0_7] : memref<8x64xf32, #tpu.memory_space<vmem>>, vector<8x64xf32>
    tpu.vector_store %arg10[%c0_6, %c0_7], %6 {strides = array<i32>} : memref<8x64xf32, #tpu.memory_space<vmem>>, vector<8x64xf32>,
    %c0_8 = arith.constant 0 : index
    %c0_9 = arith.constant 0 : index
    %8 = vector.load %arg5[%c0_8, %c0_9] : memref<8x8xf32, #tpu.memory_space<vmem>>, vector<8x8xf32>
    %cst_10 = arith.constant dense<0.000000e+00> : vector<8x64xf32>
    %9 = tpu.matmul %8, %1, %cst_10 {dimension_numbers = #tpu.dot_dimension_numbers<[1], [1], [0], [0], [0, 0, 1, 0], [], []>} : vector<8x8xf32>, vector<64x8xf32>, vector<8x64xf32> -> vector<8x64xf32>
    %c0_11 = arith.constant 0 : index
    %c0_12 = arith.constant 0 : index
    %10 = vector.load %arg6[%c0_11, %c0_12] : memref<8x1xf32, #tpu.memory_space<vmem>>, vector<8x1xf32>
    %11 = vector.broadcast %10 : vector<8x1xf32> to vector<8x64xf32>
    %12 = arith.addf %9, %11 : vector<8x64xf32>
    %c0_13 = arith.constant 0 : index
    %c0_14 = arith.constant 0 : index
    %13 = vector.load %arg11[%c0_13, %c0_14] : memref<8x64xf32, #tpu.memory_space<vmem>>, vector<8x64xf32>
    tpu.vector_store %arg11[%c0_13, %c0_14], %12 {strides = array<i32>} : memref<8x64xf32, #tpu.memory_space<vmem>>, vector<8x64xf32>,
    %c0_15 = arith.constant 0 : index
    %c0_16 = arith.constant 0 : index
    %14 = vector.load %arg7[%c0_15, %c0_16] : memref<2x8xf32, #tpu.memory_space<vmem>>, vector<2x8xf32>
    %c0_17 = arith.constant 0 : index
    %c0_18 = arith.constant 0 : index
    %15 = vector.load %arg8[%c0_17, %c0_18] : memref<8x2xf32, #tpu.memory_space<vmem>>, vector<8x2xf32>
    %c0_19 = arith.constant 0 : index
    %c0_20 = arith.constant 0 : index
    %c0_21 = arith.constant 0 : index
    %16 = vector.load %arg2[%c0_19, %c0_20, %c0_21] : memref<1x8x5xf32, #tpu.memory_space<vmem>>, vector<1x8x1xf32>
    %17 = vector.shape_cast %16 : vector<1x8x1xf32> to vector<8x1xf32>
    %c0_22 = arith.constant 0 : index
    %c0_23 = arith.constant 0 : index
    %18 = vector.load %arg10[%c0_22, %c0_23] : memref<8x64xf32, #tpu.memory_space<vmem>>, vector<8x64xf32>
    %c0_24 = arith.constant 0 : index
    %c0_25 = arith.constant 0 : index
    %19 = vector.load %arg11[%c0_24, %c0_25] : memref<8x64xf32, #tpu.memory_space<vmem>>, vector<8x64xf32>
    %20 = vector.broadcast %17 : vector<8x1xf32> to vector<8x64xf32>
    %21 = arith.mulf %20, %18 : vector<8x64xf32>
    %cst_26 = arith.constant dense<0.000000e+00> : vector<2x64xf32>
    %22 = tpu.matmul %14, %21, %cst_26 {dimension_numbers = #tpu.dot_dimension_numbers<[1], [0], [0], [1], [0, 0, 1, 1], [], []>} : vector<2x8xf32>, vector<8x64xf32>, vector<2x64xf32> -> vector<2x64xf32>
    %cst_27 = arith.constant 5.000000e-01 : f32
    %23 = vector.broadcast %cst_27 : f32 to vector<2x64xf32>
    %24 = arith.mulf %22, %23 : vector<2x64xf32>
    %cst_28 = arith.constant dense<0xFF800000> : vector<2xf32>
    %25 = vector.multi_reduction <maximumf>, %24, %cst_28 [1] : vector<2x64xf32> to vector<2xf32>
    %26 = vector.shape_cast %25 : vector<2xf32> to vector<2x1xf32>
    %27 = vector.broadcast %26 : vector<2x1xf32> to vector<2x64xf32>
    %28 = arith.subf %24, %27 : vector<2x64xf32>
    %29 = math.exp %28 : vector<2x64xf32>
    %cst_29 = arith.constant dense<0.000000e+00> : vector<2xf32>
    %30 = vector.multi_reduction <add>, %29, %cst_29 [1] : vector<2x64xf32> to vector<2xf32>
    %31 = vector.shape_cast %30 : vector<2xf32> to vector<2x1xf32>
    %32 = tpu.reciprocal %31 : vector<2x1xf32> -> vector<2x1xf32>
    %33 = vector.broadcast %32 : vector<2x1xf32> to vector<2x64xf32>
    %34 = arith.mulf %29, %33 : vector<2x64xf32>
    %cst_30 = arith.constant dense<0.000000e+00> : vector<8x64xf32>
    %35 = tpu.matmul %15, %34, %cst_30 {dimension_numbers = #tpu.dot_dimension_numbers<[1], [0], [0], [1], [0, 0, 1, 1], [], []>} : vector<8x2xf32>, vector<2x64xf32>, vector<8x64xf32> -> vector<8x64xf32>
    %36 = arith.mulf %19, %35 : vector<8x64xf32>
    %cst_31 = arith.constant dense<0.000000e+00> : vector<8xf32>
    %37 = vector.multi_reduction <add>, %36, %cst_31 [1] : vector<8x64xf32> to vector<8xf32>
    %38 = vector.shape_cast %37 : vector<8xf32> to vector<8x1xf32>
    %c0_32 = arith.constant 0 : index
    %c0_33 = arith.constant 0 : index
    %c0_34 = arith.constant 0 : index
    %39 = vector.load %arg9[%c0_32, %c0_33, %c0_34] : memref<1x8x5xf32, #tpu.memory_space<vmem>>, vector<1x8x1xf32>
    %40 = vector.shape_cast %39 : vector<1x8x1xf32> to vector<8x1xf32>
    %41 = vector.shape_cast %38 : vector<8x1xf32> to vector<1x8x1xf32>
    tpu.vector_store %arg9[%c0_32, %c0_33, %c0_34], %41 {strides = array<i32>} : memref<1x8x5xf32, #tpu.memory_space<vmem>>, vector<1x8x1xf32>,
    %c0_35 = arith.constant 0 : index
    %c0_36 = arith.constant 0 : index
    %c1 = arith.constant 1 : index
    %42 = vector.load %arg2[%c0_35, %c0_36, %c1] : memref<1x8x5xf32, #tpu.memory_space<vmem>>, vector<1x8x1xf32>
    %43 = vector.shape_cast %42 : vector<1x8x1xf32> to vector<8x1xf32>
    %c0_37 = arith.constant 0 : index
    %c0_38 = arith.constant 0 : index
    %44 = vector.load %arg10[%c0_37, %c0_38] : memref<8x64xf32, #tpu.memory_space<vmem>>, vector<8x16xf32>
    %c0_39 = arith.constant 0 : index
    %c0_40 = arith.constant 0 : index
    %45 = vector.load %arg11[%c0_39, %c0_40] : memref<8x64xf32, #tpu.memory_space<vmem>>, vector<8x16xf32>
    %46 = vector.broadcast %43 : vector<8x1xf32> to vector<8x16xf32>
    %47 = arith.mulf %46, %44 : vector<8x16xf32>
    %cst_41 = arith.constant dense<0.000000e+00> : vector<2x16xf32>
    %48 = tpu.matmul %14, %47, %cst_41 {dimension_numbers = #tpu.dot_dimension_numbers<[1], [0], [0], [1], [0, 0, 1, 1], [], []>} : vector<2x8xf32>, vector<8x16xf32>, vector<2x16xf32> -> vector<2x16xf32>
    %cst_42 = arith.constant 5.000000e-01 : f32
    %49 = vector.broadcast %cst_42 : f32 to vector<2x16xf32>
    %50 = arith.mulf %48, %49 : vector<2x16xf32>
    %cst_43 = arith.constant dense<0xFF800000> : vector<2xf32>
    %51 = vector.multi_reduction <maximumf>, %50, %cst_43 [1] : vector<2x16xf32> to vector<2xf32>
    %52 = vector.shape_cast %51 : vector<2xf32> to vector<2x1xf32>
    %53 = vector.broadcast %52 : vector<2x1xf32> to vector<2x16xf32>
    %54 = arith.subf %50, %53 : vector<2x16xf32>
    %55 = math.exp %54 : vector<2x16xf32>
    %cst_44 = arith.constant dense<0.000000e+00> : vector<2xf32>
    %56 = vector.multi_reduction <add>, %55, %cst_44 [1] : vector<2x16xf32> to vector<2xf32>
    %57 = vector.shape_cast %56 : vector<2xf32> to vector<2x1xf32>
    %58 = tpu.reciprocal %57 : vector<2x1xf32> -> vector<2x1xf32>
    %59 = vector.broadcast %58 : vector<2x1xf32> to vector<2x16xf32>
    %60 = arith.mulf %55, %59 : vector<2x16xf32>
    %cst_45 = arith.constant dense<0.000000e+00> : vector<8x16xf32>
    %61 = tpu.matmul %15, %60, %cst_45 {dimension_numbers = #tpu.dot_dimension_numbers<[1], [0], [0], [1], [0, 0, 1, 1], [], []>} : vector<8x2xf32>, vector<2x16xf32>, vector<8x16xf32> -> vector<8x16xf32>
    %62 = arith.mulf %45, %61 : vector<8x16xf32>
    %cst_46 = arith.constant dense<0.000000e+00> : vector<8xf32>
    %63 = vector.multi_reduction <add>, %62, %cst_46 [1] : vector<8x16xf32> to vector<8xf32>
    %64 = vector.shape_cast %63 : vector<8xf32> to vector<8x1xf32>
    %c0_47 = arith.constant 0 : index
    %c0_48 = arith.constant 0 : index
    %c1_49 = arith.constant 1 : index
    %65 = vector.load %arg9[%c0_47, %c0_48, %c1_49] : memref<1x8x5xf32, #tpu.memory_space<vmem>>, vector<1x8x1xf32>
    %66 = vector.shape_cast %65 : vector<1x8x1xf32> to vector<8x1xf32>
    %67 = vector.shape_cast %64 : vector<8x1xf32> to vector<1x8x1xf32>
    tpu.vector_store %arg9[%c0_47, %c0_48, %c1_49], %67 {strides = array<i32>} : memref<1x8x5xf32, #tpu.memory_space<vmem>>, vector<1x8x1xf32>,
    %c0_50 = arith.constant 0 : index
    %c0_51 = arith.constant 0 : index
    %c2 = arith.constant 2 : index
    %68 = vector.load %arg2[%c0_50, %c0_51, %c2] : memref<1x8x5xf32, #tpu.memory_space<vmem>>, vector<1x8x1xf32>
    %69 = vector.shape_cast %68 : vector<1x8x1xf32> to vector<8x1xf32>
    %c0_52 = arith.constant 0 : index
    %c16 = arith.constant 16 : index
    %70 = vector.load %arg10[%c0_52, %c16] : memref<8x64xf32, #tpu.memory_space<vmem>>, vector<8x16xf32>
    %c0_53 = arith.constant 0 : index
    %c16_54 = arith.constant 16 : index
    %71 = vector.load %arg11[%c0_53, %c16_54] : memref<8x64xf32, #tpu.memory_space<vmem>>, vector<8x16xf32>
    %72 = vector.broadcast %69 : vector<8x1xf32> to vector<8x16xf32>
    %73 = arith.mulf %72, %70 : vector<8x16xf32>
    %cst_55 = arith.constant dense<0.000000e+00> : vector<2x16xf32>
    %74 = tpu.matmul %14, %73, %cst_55 {dimension_numbers = #tpu.dot_dimension_numbers<[1], [0], [0], [1], [0, 0, 1, 1], [], []>} : vector<2x8xf32>, vector<8x16xf32>, vector<2x16xf32> -> vector<2x16xf32>
    %cst_56 = arith.constant 5.000000e-01 : f32
    %75 = vector.broadcast %cst_56 : f32 to vector<2x16xf32>
    %76 = arith.mulf %74, %75 : vector<2x16xf32>
    %cst_57 = arith.constant dense<0xFF800000> : vector<2xf32>
    %77 = vector.multi_reduction <maximumf>, %76, %cst_57 [1] : vector<2x16xf32> to vector<2xf32>
    %78 = vector.shape_cast %77 : vector<2xf32> to vector<2x1xf32>
    %79 = vector.broadcast %78 : vector<2x1xf32> to vector<2x16xf32>
    %80 = arith.subf %76, %79 : vector<2x16xf32>
    %81 = math.exp %80 : vector<2x16xf32>
    %cst_58 = arith.constant dense<0.000000e+00> : vector<2xf32>
    %82 = vector.multi_reduction <add>, %81, %cst_58 [1] : vector<2x16xf32> to vector<2xf32>
    %83 = vector.shape_cast %82 : vector<2xf32> to vector<2x1xf32>
    %84 = tpu.reciprocal %83 : vector<2x1xf32> -> vector<2x1xf32>
    %85 = vector.broadcast %84 : vector<2x1xf32> to vector<2x16xf32>
    %86 = arith.mulf %81, %85 : vector<2x16xf32>
    %cst_59 = arith.constant dense<0.000000e+00> : vector<8x16xf32>
    %87 = tpu.matmul %15, %86, %cst_59 {dimension_numbers = #tpu.dot_dimension_numbers<[1], [0], [0], [1], [0, 0, 1, 1], [], []>} : vector<8x2xf32>, vector<2x16xf32>, vector<8x16xf32> -> vector<8x16xf32>
    %88 = arith.mulf %71, %87 : vector<8x16xf32>
    %cst_60 = arith.constant dense<0.000000e+00> : vector<8xf32>
    %89 = vector.multi_reduction <add>, %88, %cst_60 [1] : vector<8x16xf32> to vector<8xf32>
    %90 = vector.shape_cast %89 : vector<8xf32> to vector<8x1xf32>
    %c0_61 = arith.constant 0 : index
    %c0_62 = arith.constant 0 : index
    %c2_63 = arith.constant 2 : index
    %91 = vector.load %arg9[%c0_61, %c0_62, %c2_63] : memref<1x8x5xf32, #tpu.memory_space<vmem>>, vector<1x8x1xf32>
    %92 = vector.shape_cast %91 : vector<1x8x1xf32> to vector<8x1xf32>
    %93 = vector.shape_cast %90 : vector<8x1xf32> to vector<1x8x1xf32>
    tpu.vector_store %arg9[%c0_61, %c0_62, %c2_63], %93 {strides = array<i32>} : memref<1x8x5xf32, #tpu.memory_space<vmem>>, vector<1x8x1xf32>,
    %c0_64 = arith.constant 0 : index
    %c0_65 = arith.constant 0 : index
    %c3 = arith.constant 3 : index
    %94 = vector.load %arg2[%c0_64, %c0_65, %c3] : memref<1x8x5xf32, #tpu.memory_space<vmem>>, vector<1x8x1xf32>
    %95 = vector.shape_cast %94 : vector<1x8x1xf32> to vector<8x1xf32>
    %c0_66 = arith.constant 0 : index
    %c32 = arith.constant 32 : index
    %96 = vector.load %arg10[%c0_66, %c32] : memref<8x64xf32, #tpu.memory_space<vmem>>, vector<8x16xf32>
    %c0_67 = arith.constant 0 : index
    %c32_68 = arith.constant 32 : index
    %97 = vector.load %arg11[%c0_67, %c32_68] : memref<8x64xf32, #tpu.memory_space<vmem>>, vector<8x16xf32>
    %98 = vector.broadcast %95 : vector<8x1xf32> to vector<8x16xf32>
    %99 = arith.mulf %98, %96 : vector<8x16xf32>
    %cst_69 = arith.constant dense<0.000000e+00> : vector<2x16xf32>
    %100 = tpu.matmul %14, %99, %cst_69 {dimension_numbers = #tpu.dot_dimension_numbers<[1], [0], [0], [1], [0, 0, 1, 1], [], []>} : vector<2x8xf32>, vector<8x16xf32>, vector<2x16xf32> -> vector<2x16xf32>
    %cst_70 = arith.constant 5.000000e-01 : f32
    %101 = vector.broadcast %cst_70 : f32 to vector<2x16xf32>
    %102 = arith.mulf %100, %101 : vector<2x16xf32>
    %cst_71 = arith.constant dense<0xFF800000> : vector<2xf32>
    %103 = vector.multi_reduction <maximumf>, %102, %cst_71 [1] : vector<2x16xf32> to vector<2xf32>
    %104 = vector.shape_cast %103 : vector<2xf32> to vector<2x1xf32>
    %105 = vector.broadcast %104 : vector<2x1xf32> to vector<2x16xf32>
    %106 = arith.subf %102, %105 : vector<2x16xf32>
    %107 = math.exp %106 : vector<2x16xf32>
    %cst_72 = arith.constant dense<0.000000e+00> : vector<2xf32>
    %108 = vector.multi_reduction <add>, %107, %cst_72 [1] : vector<2x16xf32> to vector<2xf32>
    %109 = vector.shape_cast %108 : vector<2xf32> to vector<2x1xf32>
    %110 = tpu.reciprocal %109 : vector<2x1xf32> -> vector<2x1xf32>
    %111 = vector.broadcast %110 : vector<2x1xf32> to vector<2x16xf32>
    %112 = arith.mulf %107, %111 : vector<2x16xf32>
    %cst_73 = arith.constant dense<0.000000e+00> : vector<8x16xf32>
    %113 = tpu.matmul %15, %112, %cst_73 {dimension_numbers = #tpu.dot_dimension_numbers<[1], [0], [0], [1], [0, 0, 1, 1], [], []>} : vector<8x2xf32>, vector<2x16xf32>, vector<8x16xf32> -> vector<8x16xf32>
    %114 = arith.mulf %97, %113 : vector<8x16xf32>
    %cst_74 = arith.constant dense<0.000000e+00> : vector<8xf32>
    %115 = vector.multi_reduction <add>, %114, %cst_74 [1] : vector<8x16xf32> to vector<8xf32>
    %116 = vector.shape_cast %115 : vector<8xf32> to vector<8x1xf32>
    %c0_75 = arith.constant 0 : index
    %c0_76 = arith.constant 0 : index
    %c3_77 = arith.constant 3 : index
    %117 = vector.load %arg9[%c0_75, %c0_76, %c3_77] : memref<1x8x5xf32, #tpu.memory_space<vmem>>, vector<1x8x1xf32>
    %118 = vector.shape_cast %117 : vector<1x8x1xf32> to vector<8x1xf32>
    %119 = vector.shape_cast %116 : vector<8x1xf32> to vector<1x8x1xf32>
    tpu.vector_store %arg9[%c0_75, %c0_76, %c3_77], %119 {strides = array<i32>} : memref<1x8x5xf32, #tpu.memory_space<vmem>>, vector<1x8x1xf32>,
    %c0_78 = arith.constant 0 : index
    %c0_79 = arith.constant 0 : index
    %c4 = arith.constant 4 : index
    %120 = vector.load %arg2[%c0_78, %c0_79, %c4] : memref<1x8x5xf32, #tpu.memory_space<vmem>>, vector<1x8x1xf32>
    %121 = vector.shape_cast %120 : vector<1x8x1xf32> to vector<8x1xf32>
    %c0_80 = arith.constant 0 : index
    %c48 = arith.constant 48 : index
    %122 = vector.load %arg10[%c0_80, %c48] : memref<8x64xf32, #tpu.memory_space<vmem>>, vector<8x16xf32>
    %c0_81 = arith.constant 0 : index
    %c48_82 = arith.constant 48 : index
    %123 = vector.load %arg11[%c0_81, %c48_82] : memref<8x64xf32, #tpu.memory_space<vmem>>, vector<8x16xf32>
    %124 = vector.broadcast %121 : vector<8x1xf32> to vector<8x16xf32>
    %125 = arith.mulf %124, %122 : vector<8x16xf32>
    %cst_83 = arith.constant dense<0.000000e+00> : vector<2x16xf32>
    %126 = tpu.matmul %14, %125, %cst_83 {dimension_numbers = #tpu.dot_dimension_numbers<[1], [0], [0], [1], [0, 0, 1, 1], [], []>} : vector<2x8xf32>, vector<8x16xf32>, vector<2x16xf32> -> vector<2x16xf32>
    %cst_84 = arith.constant 5.000000e-01 : f32
    %127 = vector.broadcast %cst_84 : f32 to vector<2x16xf32>
    %128 = arith.mulf %126, %127 : vector<2x16xf32>
    %cst_85 = arith.constant dense<0xFF800000> : vector<2xf32>
    %129 = vector.multi_reduction <maximumf>, %128, %cst_85 [1] : vector<2x16xf32> to vector<2xf32>
    %130 = vector.shape_cast %129 : vector<2xf32> to vector<2x1xf32>
    %131 = vector.broadcast %130 : vector<2x1xf32> to vector<2x16xf32>
    %132 = arith.subf %128, %131 : vector<2x16xf32>
    %133 = math.exp %132 : vector<2x16xf32>
    %cst_86 = arith.constant dense<0.000000e+00> : vector<2xf32>
    %134 = vector.multi_reduction <add>, %133, %cst_86 [1] : vector<2x16xf32> to vector<2xf32>
    %135 = vector.shape_cast %134 : vector<2xf32> to vector<2x1xf32>
    %136 = tpu.reciprocal %135 : vector<2x1xf32> -> vector<2x1xf32>
    %137 = vector.broadcast %136 : vector<2x1xf32> to vector<2x16xf32>
    %138 = arith.mulf %133, %137 : vector<2x16xf32>
    %cst_87 = arith.constant dense<0.000000e+00> : vector<8x16xf32>
    %139 = tpu.matmul %15, %138, %cst_87 {dimension_numbers = #tpu.dot_dimension_numbers<[1], [0], [0], [1], [0, 0, 1, 1], [], []>} : vector<8x2xf32>, vector<2x16xf32>, vector<8x16xf32> -> vector<8x16xf32>
    %140 = arith.mulf %123, %139 : vector<8x16xf32>
    %cst_88 = arith.constant dense<0.000000e+00> : vector<8xf32>
    %141 = vector.multi_reduction <add>, %140, %cst_88 [1] : vector<8x16xf32> to vector<8xf32>
    %142 = vector.shape_cast %141 : vector<8xf32> to vector<8x1xf32>
    %c0_89 = arith.constant 0 : index
    %c0_90 = arith.constant 0 : index
    %c4_91 = arith.constant 4 : index
    %143 = vector.load %arg9[%c0_89, %c0_90, %c4_91] : memref<1x8x5xf32, #tpu.memory_space<vmem>>, vector<1x8x1xf32>
    %144 = vector.shape_cast %143 : vector<1x8x1xf32> to vector<8x1xf32>
    %145 = vector.shape_cast %142 : vector<8x1xf32> to vector<1x8x1xf32>
    tpu.vector_store %arg9[%c0_89, %c0_90, %c4_91], %145 {strides = array<i32>} : memref<1x8x5xf32, #tpu.memory_space<vmem>>, vector<1x8x1xf32>,
    return
  }
  func.func @transform_0(%arg0: i32) -> (i32, i32, i32) {
    %c0_i32 = arith.constant 0 : i32
    %c0_i32_0 = arith.constant 0 : i32
    %c0_i32_1 = arith.constant 0 : i32
    return %arg0, %c0_i32, %c0_i32_0 : i32, i32, i32
  }
  func.func @transform_1(%arg0: i32) -> (i32, i32, i32) {
    %c0_i32 = arith.constant 0 : i32
    %c0_i32_0 = arith.constant 0 : i32
    %c0_i32_1 = arith.constant 0 : i32
    return %arg0, %c0_i32, %c0_i32_0 : i32, i32, i32
  }
  func.func @transform_2(%arg0: i32) -> (i32, i32) {
    %c0_i32 = arith.constant 0 : i32
    %c0_i32_0 = arith.constant 0 : i32
    %c0_i32_1 = arith.constant 0 : i32
    return %c0_i32, %c0_i32_0 : i32, i32
  }
  func.func @transform_3(%arg0: i32) -> (i32, i32) {
    %c0_i32 = arith.constant 0 : i32
    %c0_i32_0 = arith.constant 0 : i32
    %c0_i32_1 = arith.constant 0 : i32
    return %c0_i32, %c0_i32_0 : i32, i32
  }
  func.func @transform_4(%arg0: i32) -> (i32, i32) {
    %c0_i32 = arith.constant 0 : i32
    %c0_i32_0 = arith.constant 0 : i32
    %c0_i32_1 = arith.constant 0 : i32
    return %c0_i32, %c0_i32_0 : i32, i32
  }
  func.func @transform_5(%arg0: i32) -> (i32, i32) {
    %c0_i32 = arith.constant 0 : i32
    %c0_i32_0 = arith.constant 0 : i32
    %c0_i32_1 = arith.constant 0 : i32
    return %c0_i32, %c0_i32_0 : i32, i32
  }
  func.func @transform_6(%arg0: i32) -> (i32, i32) {
    %c0_i32 = arith.constant 0 : i32
    %c0_i32_0 = arith.constant 0 : i32
    %c0_i32_1 = arith.constant 0 : i32
    return %c0_i32, %c0_i32_0 : i32, i32
  }
  func.func @transform_7(%arg0: i32) -> (i32, i32) {
    %c0_i32 = arith.constant 0 : i32
    %c0_i32_0 = arith.constant 0 : i32
    %c0_i32_1 = arith.constant 0 : i32
    return %c0_i32, %c0_i32_0 : i32, i32
  }
  func.func @transform_8(%arg0: i32) -> (i32, i32, i32) {
    %c0_i32 = arith.constant 0 : i32
    %c0_i32_0 = arith.constant 0 : i32
    %c0_i32_1 = arith.constant 0 : i32
    return %arg0, %c0_i32, %c0_i32_0 : i32, i32, i32
  }
}

</mosaic_0001>

<bundles_post_ra>
// kernel: pd_attention_forward.3
= control target key start
LH: loop header
LB: loop body
LE: loop exit
PB: predicated region body
PF: predicated region fallthrough
CT: control target
= control target key end

     0   :  { %s538_s12 = smov 0   ;;  %s540_s13 = smov 0   ;;  %s596_s0 = inlined_call_operand.vmem [shape: f32[2,64,8], index: 0, kind: input, shape index: {}]   ;;  %s597_s1 = inlined_call_operand.vmem [shape: f32[8,8], index: 1, kind: input, shape index: {}]   ;;  %s598_s2 = inlined_call_operand.vmem [shape: f32[8,1], index: 2, kind: input, shape index: {}]   ;;  %s599_s3 = inlined_call_operand.vmem [shape: f32[2,8,64], index: 3, kind: output, shape index: {}]  }
   0x1   :  { %s542_s14 = smov 0  }
   0x2 LB: > { %s25_s15 = sadd.s32 1, %s508_s13  ;;  %p401_p0 = scmp.ge.s32.totalorder %s512_s14, 1  ;;  %s512_s14 = sphi %s542_s14, %s13_s14   ;;  %s508_s13 = sphi %s540_s13, %s603_s13   ;;  %s504_s12 = sphi %s538_s12, %s602_s12  }
   0x3   : > { %p27_p1 = scmp.ge.s32.totalorder %s25_s15, 2  ;;  %p158_p2 = scmp.lt.s32.totalorder %s512_s14, 3 }
   0x5   : > { %s605_s15 = smov (%p27_p1, %s25_s15), 0  ;;  %p159_p3 = pnand %p401_p0, %p158_p2 }
   0x6   : > { %p189_p4 = scmp.lt.s32.totalorder (!%p159_p3), %s504_s12, 1  ;;  %v514_v0 = vmov (!%p159_p3), 0.0|0.0   ;;  %vm515_vm0 = vmmov (!%p159_p3), 0   ;;  %v516_v1 = vmov (!%p159_p3), 0.0   ;;  %v214_v2 = vld [vmem:[%s598_s2] sm:$0xff] (!%p159_p3)  ;;  %v517_v3 = vmov (!%p159_p3), 0  }
   0x7   : > { %162 = sbr.rel (%p159_p3) target bundleno = 266 (0x10a), region = 32  ;;  %445 = vmatprep.subr.bf16.mxu0 (!%p159_p3), %v514_v0  ;;  %442 = vmatprep.mubr.msk.f32.mxu0 (!%p159_p3), %vm515_vm0, %v516_v1  ;;  %vm220_vm1 = vcmask (!%p159_p3), 64512   ;;  %v205_v17 = vld [vmem:[%s597_s1] sm:$0xff] (!%p159_p3)  ;;  %vm318_vm3 = vcmask (!%p159_p3), 523264  }
   0x8   : > { %489 = vset.pattern.permute.xlu0 (!%p159_p3), %v517_v3  ;;  %vm567_vm2 = vmpackc.low (!%p159_p3), %vm220_vm1, %vm220_vm1 }
   0x9   : > { %217 = vperm.xlu0 (!%p159_p3), %489, %v214_v2  }
   0xe   : > { %s607_s12 = smov (!%p189_p4, %s504_s12), 1 }
   0xf   : > { %s416_s18 = sshll.u32 %s607_s12, 6  ;;  %s404_s24 = sshll.u32 %s607_s12, 3 }
  0x10   : > { %s196_s21 = scalar_lea.vmem %s596_s0, %s416_s18  ;;  %s204_s27 = scalar_lea.vmem %s599_s3, %s404_s24 }
  0x11   : > { %v206_v4 = vld [vmem:[%s196_s21] sm:$0xff]  ;;  %v207_v5 = vld [vmem:[%s196_s21 + $0x8] sm:$0xff]  ;;  %v208_v8 = vld [vmem:[%s196_s21 + $0x10] sm:$0xff] }
  0x12   : > { %v446_v7 = vpack.c.bf16 %v207_v5, %v206_v4  ;;  %v209_v9 = vld [vmem:[%s196_s21 + $0x18] sm:$0xff]  ;;  %v210_v11 = vld [vmem:[%s196_s21 + $0x20] sm:$0xff]  ;;  %v211_v12 = vld [vmem:[%s196_s21 + $0x28] sm:$0xff] }
  0x13   : > { %v450_v10 = vpack.c.bf16 %v209_v9, %v208_v8  ;;  %v454_v13 = vpack.c.bf16 %v211_v12, %v210_v11  ;;  %v212_v14 = vld [vmem:[%s196_s21 + $0x30] sm:$0xff]  ;;  %v213_v15 = vld [vmem:[%s196_s21 + $0x38] sm:$0xff] }
  0x14   : > { %448 = vmatpush3.bf16.xpose.msk.msra.mxu0 %vm567_vm2, %v446_v7  ;;  %v458_v16 = vpack.c.bf16 %v213_v15, %v212_v14 }
  0x15   : > { %449 = vmatprep.subr.bf16.mxu0 %v514_v0 }
  0x1c   : > { %452 = vmatpush3.bf16.xpose.msk.msra.mxu0 %vm567_vm2, %v450_v10 }
  0x1d   : > { %453 = vmatprep.subr.bf16.mxu0 %v514_v0 }
  0x24   : > { %456 = vmatpush3.bf16.xpose.msk.msra.mxu0 %vm567_vm2, %v454_v13 }
  0x25   : > { %457 = vmatprep.subr.bf16.mxu0 %v514_v0 }
  0x2c   : > { %460 = vmatpush3.bf16.xpose.msk.msra.mxu0 %vm567_vm2, %v458_v16 }
  0x33   : > { %443 = vmatmul.mubr.msk.f32.vlgmr.msra.gmra.mrb[0].mxu0 %vm220_vm1, %v205_v17 }
  0x88   : > { %v218_v18 = vpop.permute.xlu0 %217 }
 0x106   : > { %v314_v19 = vpop.f32.mrb[0].mxu0 }
 0x107   : > { %v315_v20 = vadd.f32 %v314_v19, %v218_v18  ;;  %v444_v21 = vpop.f32.mrb[1].mxu0 }
 0x109   : > { %319 = vst.msk [vmem:[%s204_s27] sm:$0xff] %vm318_vm3, %v315_v20 }
 0x10a PF: > { %s13_s14 = sadd.s32 1, %s512_s14   ;;  %s602_s12 = smov %s508_s13 }
 0x10b   : > { %p10_p5 = scmp.ge.s32.totalorder %s13_s14, 4   ;;  %s603_s13 = smov %s605_s15 }
 0x10d   :  { %12 = sbr.rel (!%p10_p5) target bundleno = 2 (0x2), region = 62 }

// kernel: pd_attention_forward.4
= control target key start
LH: loop header
LB: loop body
LE: loop exit
PB: predicated region body
PF: predicated region fallthrough
CT: control target
= control target key end

     0   :  { %s543_s15 = smov 0   ;;  %s545_s16 = smov 0   ;;  %s589_s0 = inlined_call_operand.vmem [shape: f32[2,8,64], index: 0, kind: input, shape index: {}]   ;;  %s590_s1 = inlined_call_operand.vmem [shape: f32[8,1], index: 1, kind: input, shape index: {}]   ;;  %s591_s2 = inlined_call_operand.vmem [shape: f32[8,1], index: 2, kind: input, shape index: {}]   ;;  %s592_s3 = inlined_call_operand.vmem [shape: f32[2,8], index: 3, kind: input, shape index: {}]   ;;  %s593_s4 = inlined_call_operand.vmem [shape: f32[2,2,64], index: 4, kind: output, shape index: {}]  }
   0x1   :  { %s547_s17 = smov 0  }
   0x2 LB: > { %s26_s18 = sadd.s32 1, %s509_s16  ;;  %p444_p0 = scmp.ge.s32.totalorder %s513_s17, 1  ;;  %s513_s17 = sphi %s547_s17, %s14_s17   ;;  %s509_s16 = sphi %s545_s16, %s595_s16   ;;  %s505_s15 = sphi %s543_s15, %s594_s15  }
   0x3   : > { %p28_p1 = scmp.ge.s32.totalorder %s26_s18, 2  ;;  %p180_p2 = scmp.lt.s32.totalorder %s513_s17, 3 }
   0x5   : > { %s597_s18 = smov (%p28_p1, %s26_s18), 0  ;;  %p181_p3 = pnand %p444_p0, %p180_p2 }
   0x6   : > { %v248_v0 = vld [vmem:[%s590_s1] sm:$0xff] (!%p181_p3)  ;;  %v515_v1 = vmov (!%p181_p3), 0   ;;  %v516_v3 = vmov (!%p181_p3), 0.0   ;;  %p210_p4 = scmp.lt.s32.totalorder (!%p181_p3), %s505_s15, 1  ;;  %vm225_vm0 = vcmask (!%p181_p3), 523264   ;;  %vm517_vm1 = vmmov (!%p181_p3), 0  }
   0x7   : > { %184 = sbr.rel (%p181_p3) target bundleno = 404 (0x194), region = 36  ;;  %484 = vset.pattern.permute.xlu0 (!%p181_p3), %v515_v1  ;;  %v255_v2 = vld [vmem:[%s591_s2] sm:$0xff] (!%p181_p3)  ;;  %452 = vmatprep.subr.mxu0 (!%p181_p3), %v516_v3  ;;  %vm290_vm3 = vcmask (!%p181_p3), 64512   ;;  %vm364_vm4 = vcmask (!%p181_p3), 517120  }
   0x8   : > { %251 = vperm.xlu0 (!%p181_p3), %484, %v248_v0   ;;  %454 = vmatprep.mubr.msk.f32.mxu0 (!%p181_p3), %vm517_vm1, %v516_v3  ;;  %v289_v55 = vld [vmem:[%s592_s3] sm:$0x3] (!%p181_p3) }
   0xc   : > { %258 = vperm.xlu0 (!%p181_p3), %484, %v255_v2  }
   0xe   : > { %s599_s15 = smov (!%p210_p4, %s505_s15), 1 }
   0xf   : > { %s445_s23 = sshll.u32 %s599_s15, 3  ;;  %s446_s29 = sshll.u32 %s599_s15, 1 }
  0x10   : > { %s216_s26 = scalar_lea.vmem %s589_s0, %s445_s23  ;;  %s223_s6 = scalar_lea.vmem %s593_s4, %s446_s29 }
  0x11   : > { %v224_v4 = vld [vmem:[%s216_s26] sm:$0xff] }
  0x12   : > { %v226_v5 = vsel %vm225_vm0, %v224_v4, 0.0 }
  0x13   : > { %v227_v6 = vrot.slane %v226_v5, 4 }
  0x15   : > { %v228_v7 = vadd.f32 %v227_v6, %v226_v5 }
  0x17   : > { %v229_v8 = vrot.slane %v228_v7, 2 }
  0x19   : > { %v230_v9 = vadd.f32 %v229_v8, %v228_v7 }
  0x1b   : > { %v231_v10 = vrot.slane %v230_v9, 1 }
  0x1d   : > { %v232_v11 = vadd.f32 %v231_v10, %v230_v9 }
  0x1f   : > { %v234_v12 = vmul.f32 0.125, %v232_v11 }
  0x21   : > { %v235_v13 = vsub.f32 %v224_v4, %v234_v12 }
  0x23   : > { %v236_v14 = vmul.f32 %v235_v13, %v235_v13 }
  0x25   : > { %v237_v15 = vsel %vm225_vm0, %v236_v14, 0.0 }
  0x26   : > { %v238_v16 = vrot.slane %v237_v15, 4 }
  0x28   : > { %v239_v17 = vadd.f32 %v238_v16, %v237_v15 }
  0x2a   : > { %v240_v18 = vrot.slane %v239_v17, 2 }
  0x2c   : > { %v241_v19 = vadd.f32 %v240_v18, %v239_v17 }
  0x2e   : > { %v242_v20 = vrot.slane %v241_v19, 1 }
  0x30   : > { %v243_v21 = vadd.f32 %v242_v20, %v241_v19 }
  0x32   : > { %v244_v22 = vmul.f32 0.125, %v243_v21 }
  0x34   : > { %v245_v23 = vadd.f32 1e-05, %v244_v22 }
  0x36   : > { %485 = vrsqrt.f32 %v245_v23 }
  0x40   : > { %v486_v24 = vpop.eup %485 }
  0x41   : > { %v247_v25 = vmul.f32 %v486_v24, %v235_v13 }
  0x87   : > { %v252_v26 = vpop.permute.xlu0 %251 }
  0x88   : > { %v254_v27 = vmul.f32 %v252_v26, %v247_v25 }
  0x8b   : > { %v259_v28 = vpop.permute.xlu0 %258 }
  0x8c   : > { %v261_v29 = vadd.f32 %v259_v28, %v254_v27 }
  0x8e   : > { %v263_v30 = vmul.f32 0.70710677, %v261_v29  ;;  %v262_v52 = vmul.f32 0.5, %v261_v29 }
  0x90   : > { %v264_v31 = vand.u32 2147483647, %v263_v30  ;;  %vm284_vm2 = vcmp.lt.f32.partialorder %v263_v30, 0.0 }
  0x92   : > { %v265_v32 = vmul.f32 0.3275911, %v264_v31  ;;  %v278_v34 = vsub.f32 0.0, %v264_v31 }
  0x94   : > { %v266_v33 = vadd.f32 1.0, %v265_v32  ;;  %v279_v36 = vmul.f32 %v278_v34, %v264_v31 }
  0x96   : > { %487 = vrcp.f32 %v266_v33  ;;  %v280_v39 = vmul.f32 1.442695, %v279_v36 }
  0x98   : > { %489 = vpow2.f32 %v280_v39 }
  0xa0   : > { %v488_v35 = vpop.eup %487 }
  0xa1   : > { %v269_v37 = vmul.f32 1.0614054, %v488_v35 }
  0xa2   : > { %v490_v47 = vpop.eup %489 }
  0xa3   : > { %v270_v38 = vadd.f32 -1.4531521, %v269_v37 }
  0xa5   : > { %v271_v40 = vmul.f32 %v488_v35, %v270_v38 }
  0xa7   : > { %v272_v41 = vadd.f32 1.4214138, %v271_v40 }
  0xa9   : > { %v273_v42 = vmul.f32 %v488_v35, %v272_v41 }
  0xab   : > { %v274_v43 = vadd.f32 -0.28449672, %v273_v42 }
  0xad   : > { %v275_v44 = vmul.f32 %v488_v35, %v274_v43 }
  0xaf   : > { %v276_v45 = vadd.f32 0.2548296, %v275_v44 }
  0xb1   : > { %v277_v46 = vmul.f32 %v488_v35, %v276_v45 }
  0xb3   : > { %v282_v48 = vmul.f32 %v490_v47, %v277_v46 }
  0xb5   : > { %v283_v49 = vsub.f32 1.0, %v282_v48 }
  0xb7   : > { %v285_v50 = vsub.f32 0.0, %v283_v49 }
  0xb9   : > { %v286_v51 = vsel %vm284_vm2, %v285_v50, %v283_v49 }
  0xba   : > { %v287_v53 = vadd.f32 1.0, %v286_v51 }
  0xbc   : > { %v288_v54 = vmul.f32 %v287_v53, %v262_v52 }
  0xbe   : > { %453 = vmatpush3.msra.mxu0 %v288_v54 }
  0xbf   : > { %455 = vmatmul.mubr.msk.f32.vlgmr.msra.gmra.mrb[0].mxu0 %vm290_vm3, %v289_v55 }
 0x192   : > { %v360_v56 = vpop.f32.mrb[0].mxu0 }
 0x193   : > { %365 = vst.msk [vmem:[%s223_s6] sm:$0x3] %vm364_vm4, %v360_v56  ;;  %v456_v57 = vpop.f32.mrb[1].mxu0 }
 0x194 PF: > { %s14_s17 = sadd.s32 1, %s513_s17   ;;  %s594_s15 = smov %s509_s16 }
 0x195   : > { %p11_p5 = scmp.ge.s32.totalorder %s14_s17, 4   ;;  %s595_s16 = smov %s597_s18 }
 0x197   :  { %13 = sbr.rel (!%p11_p5) target bundleno = 2 (0x2), region = 66 }

// kernel: pd_attention_forward.5
= control target key start
LH: loop header
LB: loop body
LE: loop exit
PB: predicated region body
PF: predicated region fallthrough
CT: control target
= control target key end

     0   :  { %s1801_s27 = smov 0   ;;  %s1962_s0 = inlined_call_operand.vmem [shape: f32[2,64,8], index: 0, kind: input, shape index: {}]   ;;  %s1963_s1 = inlined_call_operand.vmem [shape: f32[2,8,5], index: 1, kind: input, shape index: {}]   ;;  %s1964_s2 = inlined_call_operand.vmem [shape: f32[8,8], index: 2, kind: input, shape index: {}]   ;;  %s1965_s3 = inlined_call_operand.vmem [shape: f32[8,1], index: 3, kind: input, shape index: {}]   ;;  %s1966_s4 = inlined_call_operand.vmem [shape: f32[8,8], index: 4, kind: input, shape index: {}]   ;;  %s1967_s5 = inlined_call_operand.vmem [shape: f32[8,1], index: 5, kind: input, shape index: {}]   ;;  %s1968_s6 = inlined_call_operand.vmem [shape: f32[2,8], index: 6, kind: input, shape index: {}]   ;;  %s1969_s7 = inlined_call_operand.vmem [shape: f32[8,2], index: 7, kind: input, shape index: {}]   ;;  %s1970_s8 = inlined_call_operand.vmem [shape: f32[2,8,5], index: 8, kind: output, shape index: {}]  }
   0x1 LB: > { %s1481_s28 = sadd.s32 4294967295, %s1740_s27   ;;  %p1485_p0 = scmp.ge.s32.totalorder %s1740_s27, 1  ;;  %s1740_s27 = sphi %s1801_s27, %s18_s27  }
   0x2   : > { %p271_p1 = scmp.lt.s32.totalorder %s1740_s27, 3 }
   0x4   : > { %p272_p2 = pnand %p1485_p0, %p271_p1 }
   0x5   : > { %p308_p3 = scmp.lt.s32.totalorder (!%p272_p2), %s1481_s28, 1  ;;  %v1742_v0 = vmov (!%p272_p2), 0.0|0.0   ;;  %vm1743_vm0 = vmmov (!%p272_p2), 0   ;;  %v1744_v1 = vmov (!%p272_p2), 0.0   ;;  %v330_v2 = vld [vmem:[%s1965_s3] sm:$0xff] (!%p272_p2)  ;;  %v1745_v3 = vmov (!%p272_p2), 3  }
   0x6   : > { %275 = sbr.rel (%p272_p2) target bundleno = 1515 (0x5eb), region = 52  ;;  %1652 = vmatprep.subr.bf16.mxu0 (!%p272_p2), %v1742_v0  ;;  %1580 = vmatprep.mubr.msk.f32.mxu0 (!%p272_p2), %vm1743_vm0, %v1744_v1  ;;  %v1746_v4 = vmov (!%p272_p2), 0   ;;  %vm336_vm1 = vcmask (!%p272_p2), 64512   ;;  %v1747_v9 = vmov (!%p272_p2), 2   ;;  %v1748_v14 = vmov (!%p272_p2), 4   ;;  %v329_v22 = vld [vmem:[%s1964_s2] sm:$0xff] (!%p272_p2) }
   0x7   : > { %1708 = vset.pattern.permute.xlu1 (!%p272_p2), %v1745_v3  ;;  %1706 = vset.pattern.permute.xlu0 (!%p272_p2), %v1746_v4  ;;  %vm1834_vm2 = vmpackc.low (!%p272_p2), %vm336_vm1, %vm336_vm1  ;;  %v1749_v15 = vmov (!%p272_p2), 1   ;;  %vm434_vm3 = vcmask (!%p272_p2), 523264   ;;  %v517_v36 = vld [vmem:[%s1968_s6] sm:$0x3] (!%p272_p2)  ;;  %s1750_s21 = smov (!%p272_p2), 80   ;;  %s1751_s22 = smov (!%p272_p2), 112  }
   0x8   : > { %333 = vperm.xlu0 (!%p272_p2), %1706, %v330_v2   ;;  %1668 = vmatprep.subr.bf16.mxu1 (!%p272_p2), %v1742_v0  ;;  %s1752_s23 = smov (!%p272_p2), 96   ;;  %vm602_vm4 = vcmask (!%p272_p2), 517120   ;;  %vm778_vm5 = vcmask (!%p272_p2), 123904   ;;  %vm618_vm6 = vcmask (!%p272_p2), 1041408   ;;  %vm614_vm7 = vcmask (!%p272_p2), 15360   ;;  %s1753_s11 = smov (!%p272_p2), 16  }
   0x9   : > { %1599 = vmatprep.mubr.msk.f32.mxu1 (!%p272_p2), %vm1743_vm0, %v1744_v1  ;;  %s1754_s12 = smov (!%p272_p2), 32   ;;  %vm696_vm8 = vcmask (!%p272_p2), 7168   ;;  %vm864_vm9 = vcmask (!%p272_p2), 130048   ;;  %vm868_vm10 = vcmask (!%p272_p2), 15368   ;;  %vm1050_vm11 = vcmask (!%p272_p2), 23568  }
   0xa   : > { %vm1232_vm12 = vcmask (!%p272_p2), 31768   ;;  %vm1414_vm13 = vcmask (!%p272_p2), 39968  }
   0xc   : > { %1707 = vset.pattern.permute.xlu0 (!%p272_p2), %v1747_v9  ;;  %v436_v9 = vld [vmem:[%s1966_s4] sm:$0xff] (!%p272_p2) }
   0xd   : > { %s1974_s28 = smov (!%p308_p3, %s1481_s28), 1 }
   0xe   : > { %s1525_s9 = sshll.u32 %s1974_s28, 6  ;;  %s1488_s10 = sshll.u32 %s1974_s28, 3 }
   0xf   : > { %s1823_s13 = scalar_lea.vmem %s1962_s0, %s1525_s9  ;;  %s316_s16 = scalar_lea.vmem %s1963_s1, %s1488_s10 }
  0x10   : > { %v321_v5 = vld [vmem:[%s1823_s13] sm:$0xff]  ;;  %v322_v6 = vld [vmem:[%s1823_s13 + $0x8] sm:$0xff]  ;;  %v323_v11 = vld [vmem:[%s1823_s13 + $0x10] sm:$0xff] }
  0x11   : > { %v1653_v8 = vpack.c.bf16 %v322_v6, %v321_v5  ;;  %v1052_v10 = vld [vmem:[%s316_s16] sm:$0xff]  ;;  %v324_v12 = vld [vmem:[%s1823_s13 + $0x18] sm:$0xff]  ;;  %v326_v17 = vld [vmem:[%s1823_s13 + $0x28] sm:$0xff]  ;;  %s1945_s16 = scalar_lea.vmem %s1970_s8, %s1488_s10 }
  0x12   : > { %1057 = vperm.xlu1 %1708, %v1052_v10   ;;  %875 = vperm.xlu0 %1707, %v1052_v10   ;;  %v1657_v13 = vpack.c.bf16 %v324_v12, %v323_v11  ;;  %v325_v16 = vld [vmem:[%s1823_s13 + $0x20] sm:$0xff]  ;;  %v327_v19 = vld [vmem:[%s1823_s13 + $0x30] sm:$0xff]  ;;  %v328_v20 = vld [vmem:[%s1823_s13 + $0x38] sm:$0xff]  ;;  %s1755_s13 = smov 48  }
  0x13   : > { %1655 = vmatpush3.bf16.xpose.msk.msra.mxu0 %vm1834_vm2, %v1653_v8  ;;  %1671 = vmatpush3.bf16.xpose.msk.msra.mxu1 %vm1834_vm2, %v1653_v8  ;;  %v1661_v18 = vpack.c.bf16 %v326_v17, %v325_v16  ;;  %v1665_v21 = vpack.c.bf16 %v328_v20, %v327_v19 }
  0x14   : > { %1656 = vmatprep.subr.bf16.mxu0 %v1742_v0  ;;  %1672 = vmatprep.subr.bf16.mxu1 %v1742_v0 }
  0x16   : > { %1709 = vset.pattern.permute.xlu1 %v1748_v14  ;;  %1711 = vset.pattern.permute.xlu0 %v1749_v15 }
  0x17   : > { %1239 = vperm.xlu1 %1709, %v1052_v10   ;;  %703 = vperm.xlu0 %1711, %v1052_v10  }
  0x1b   : > { %1659 = vmatpush3.bf16.xpose.msk.msra.mxu0 %vm1834_vm2, %v1657_v13  ;;  %1710 = vset.pattern.permute.xlu1 %v1746_v4 }
  0x1c   : > { %1660 = vmatprep.subr.bf16.mxu0 %v1742_v0  ;;  %524 = vperm.xlu1 %1710, %v1052_v10  }
  0x1d   : > { %1675 = vmatpush3.bf16.xpose.msk.msra.mxu1 %vm1834_vm2, %v1657_v13  ;;  %1712 = vset.pattern.permute.xlu0 %v1746_v4 }
  0x1e   : > { %1676 = vmatprep.subr.bf16.mxu1 %v1742_v0 }
  0x23   : > { %1663 = vmatpush3.bf16.xpose.msk.msra.mxu0 %vm1834_vm2, %v1661_v18 }
  0x24   : > { %1664 = vmatprep.subr.bf16.mxu0 %v1742_v0 }
  0x25   : > { %1679 = vmatpush3.bf16.xpose.msk.msra.mxu1 %vm1834_vm2, %v1661_v18 }
  0x26   : > { %1680 = vmatprep.subr.bf16.mxu1 %v1742_v0 }
  0x2b   : > { %1667 = vmatpush3.bf16.xpose.msk.msra.mxu0 %vm1834_vm2, %v1665_v21 }
  0x2c   : > { %1602 = vmatprep.subr.mxu0 %v1744_v1 }
  0x2d   : > { %1683 = vmatpush3.bf16.xpose.msk.msra.mxu1 %vm1834_vm2, %v1665_v21 }
  0x2e   : > { %1607 = vmatprep.subr.mxu1 %v1744_v1 }
  0x32   : > { %1581 = vmatmul.mubr.msk.f32.vlgmr.msra.gmra.mrb[0].mxu0 %vm336_vm1, %v329_v22 }
  0x33   : > { %1604 = vmatprep.mubr.msk.f32.mxu0 %vm1743_vm0, %v1744_v1 }
  0x34   : > { %1600 = vmatmul.mubr.msk.f32.vlgmr.msra.gmra.mrb[0].mxu1 %vm336_vm1, %v436_v9 }
  0x35   : > { %1609 = vmatprep.mubr.msk.f32.mxu1 %vm1743_vm0, %v1744_v1 }
  0x87   : > { %v334_v24 = vpop.permute.xlu0 %333 }
  0x91   : > { %v1058_v23 = vpop.permute.xlu1 %1057  ;;  %v876_v29 = vpop.permute.xlu0 %875 }
  0x96   : > { %v1240_v28 = vpop.permute.xlu1 %1239  ;;  %v704_v34 = vpop.permute.xlu0 %703 }
  0x9b   : > { %v525_v30 = vpop.permute.xlu1 %524 }
 0x105   : > { %v430_v25 = vpop.f32.mrb[0].mxu0 }
 0x106   : > { %v431_v26 = vadd.f32 %v430_v25, %v334_v24  ;;  %v1582_v27 = vpop.f32.mrb[1].mxu0 }
 0x108   : > { %435 = vst.msk [vmem:[#allocation2] sm:$0xff] %vm434_vm3, %v431_v26 }
 0x10f   : > { %v1053_v31 = vld [vmem:[#allocation2] sm:$0xff] }
 0x110   : > { %v1242_v32 = vmul.f32 %v1240_v28, %v1053_v31  ;;  %v878_v33 = vmul.f32 %v1053_v31, %v876_v29  ;;  %v527_v35 = vmul.f32 %v1053_v31, %v525_v30  ;;  %v706_v37 = vmul.f32 %v1053_v31, %v704_v34  ;;  %v437_v28 = vld [vmem:[%s1967_s5] sm:$0xff]  ;;  %v512_v34 = vpop.f32.mrb[0].mxu1 }
 0x111   : > { %v1060_v38 = vmul.f32 %v1058_v23, %v1053_v31  ;;  %v518_v31 = vld [vmem:[%s1969_s7] sm:$0xff] }
 0x112   : > { %1244 = vrot.lane.b32.xlu0 %v1242_v32, %s1750_s21  ;;  %880 = vrot.lane.b32.xlu1 %v878_v33, %s1751_s22 }
 0x113   : > { %1603 = vmatpush3.msra.mxu0 %v527_v35 }
 0x114   : > { %1605 = vmatmul.mubr.msk.f32.vlgmr.msra.gmra.mrb[2].mxu0 %vm336_vm1, %v517_v36  ;;  %1612 = vmatprep.subr.mxu0 %v1744_v1 }
 0x115   : > { %1613 = vmatpush3.msra.mxu0 %v706_v37  ;;  %1614 = vmatprep.mubr.msk.f32.mxu0 %vm1743_vm0, %v1744_v1 }
 0x116   : > { %1062 = vrot.lane.b32.xlu1 %v1060_v38, %s1752_s23  ;;  %1622 = vmatprep.subr.mxu0 %v1744_v1 }
 0x118   : > { %1615 = vmatmul.mubr.msk.f32.vlgmr.msra.gmra.mrb[4].mxu0 %vm336_vm1, %v517_v36 }
 0x119   : > { %1624 = vmatprep.mubr.msk.f32.mxu0 %vm1743_vm0, %v1744_v1 }
 0x184   : > { %v881_v39 = vpop.permute.xlu1 %880  ;;  %v1245_v41 = vpop.permute.xlu0 %1244 }
 0x185   : > { %1623 = vmatpush3.msra.mxu0 %v881_v39 }
 0x186   : > { %1625 = vmatmul.mubr.msk.f32.vlgmr.msra.gmra.mrb[6].mxu0 %vm336_vm1, %v517_v36  ;;  %1632 = vmatprep.subr.mxu0 %v1744_v1 }
 0x187   : > { %1634 = vmatprep.mubr.msk.f32.mxu0 %vm1743_vm0, %v1744_v1 }
 0x188   : > { %v1063_v40 = vpop.permute.xlu1 %1062 }
 0x189   : > { %1633 = vmatpush3.msra.mxu0 %v1063_v40 }
 0x18a   : > { %1635 = vmatmul.mubr.msk.f32.vlgmr.msra.gmra.mrb[8].mxu0 %vm336_vm1, %v517_v36  ;;  %1642 = vmatprep.subr.mxu0 %v1744_v1 }
 0x18b   : > { %1643 = vmatpush3.msra.mxu0 %v1245_v41  ;;  %1644 = vmatprep.mubr.msk.f32.mxu0 %vm1743_vm0, %v1744_v1 }
 0x18e   : > { %1645 = vmatmul.mubr.msk.f32.vlgmr.msra.gmra.mrb[10].mxu0 %vm336_vm1, %v517_v36 }
 0x1e7   : > { %v597_v42 = vpop.f32.mrb[2].mxu0 }
 0x1e8   : > { %v601_v43 = vmul.f32 0.5, %v597_v42  ;;  %v1606_v44 = vpop.f32.mrb[3].mxu0 }
 0x1ea   : > { %v603_v45 = vsel %vm602_vm4, %v601_v43, -inf }
 0x1eb   : > { %604 = vmax.xlane.f32.xlu1 %v603_v45  ;;  %v773_v46 = vpop.f32.mrb[4].mxu0 }
 0x1ec   : > { %v777_v47 = vmul.f32 0.5, %v773_v46  ;;  %v1616_v48 = vpop.f32.mrb[5].mxu0 }
 0x1ee   : > { %v779_v49 = vsel %vm778_vm5, %v777_v47, -inf }
 0x1ef   : > { %780 = vmax.xlane.f32.xlu0 %v779_v49 }
 0x259   : > { %v949_v50 = vpop.f32.mrb[6].mxu0 }
 0x25a   : > { %v953_v51 = vmul.f32 0.5, %v949_v50  ;;  %v1626_v52 = vpop.f32.mrb[7].mxu0 }
 0x25c   : > { %v954_v53 = vsel %vm778_vm5, %v953_v51, -inf }
 0x25d   : > { %955 = vmax.xlane.f32.xlu0 %v954_v53  ;;  %v1131_v54 = vpop.f32.mrb[8].mxu0 }
 0x25e   : > { %v1135_v55 = vmul.f32 0.5, %v1131_v54  ;;  %v1636_v56 = vpop.f32.mrb[9].mxu0 }
 0x260   : > { %v1136_v57 = vsel %vm778_vm5, %v1135_v55, -inf }
 0x261   : > { %1137 = vmax.xlane.f32.xlu1 %v1136_v57  ;;  %v1313_v58 = vpop.f32.mrb[10].mxu0 }
 0x262   : > { %v1317_v59 = vmul.f32 0.5, %v1313_v58  ;;  %v1646_v60 = vpop.f32.mrb[11].mxu0 }
 0x264   : > { %v1318_v61 = vsel %vm778_vm5, %v1317_v59, -inf }
 0x265   : > { %1319 = vmax.xlane.f32.xlu0 %v1318_v61 }
 0x278   : > { %v605_v62 = vpop.xlane.xlu1 %604 }
 0x279   : > { %v606_v63 = vsub.f32 %v601_v43, %v605_v62 }
 0x27b   : > { %v607_v0 = vmul.f32 1.442695, %v606_v63 }
 0x27c   : > { %v781_v2 = vpop.xlane.xlu0 %780 }
 0x27d   : > { %1714 = vpow2.f32 %v607_v0  ;;  %v782_v3 = vsub.f32 %v777_v47, %v781_v2 }
 0x27f   : > { %v783_v4 = vmul.f32 1.442695, %v782_v3 }
 0x281   : > { %1716 = vpow2.f32 %v783_v4 }
 0x287   : > { %v1715_v5 = vpop.eup %1714 }
 0x288   : > { %v609_v6 = vsel %vm602_vm4, %v1715_v5, 0.0 }
 0x289   : > { %610 = vadd.xlane.f32.xlu1 %v609_v6 }
 0x28b   : > { %v1717_v7 = vpop.eup %1716 }
 0x28c   : > { %v785_v8 = vsel %vm778_vm5, %v1717_v7, 0.0 }
 0x28d   : > { %786 = vadd.xlane.f32.xlu0 %v785_v8 }
 0x2ea   : > { %v956_v10 = vpop.xlane.xlu0 %955 }
 0x2eb   : > { %v957_v11 = vsub.f32 %v953_v51, %v956_v10 }
 0x2ed   : > { %v958_v12 = vmul.f32 1.442695, %v957_v11 }
 0x2ee   : > { %v1138_v13 = vpop.xlane.xlu1 %1137 }
 0x2ef   : > { %1718 = vpow2.f32 %v958_v12  ;;  %v1139_v15 = vsub.f32 %v1135_v55, %v1138_v13 }
 0x2f1   : > { %v1140_v16 = vmul.f32 1.442695, %v1139_v15 }
 0x2f2   : > { %v1320_v17 = vpop.xlane.xlu0 %1319 }
 0x2f3   : > { %1720 = vpow2.f32 %v1140_v16  ;;  %v1321_v18 = vsub.f32 %v1317_v59, %v1320_v17 }
 0x2f5   : > { %v1322_v19 = vmul.f32 1.442695, %v1321_v18 }
 0x2f7   : > { %1722 = vpow2.f32 %v1322_v19 }
 0x2f9   : > { %v1719_v20 = vpop.eup %1718 }
 0x2fa   : > { %v960_v21 = vsel %vm778_vm5, %v1719_v20, 0.0 }
 0x2fb   : > { %961 = vadd.xlane.f32.xlu1 %v960_v21 }
 0x2fd   : > { %v1721_v22 = vpop.eup %1720 }
 0x2fe   : > { %v1142_v23 = vsel %vm778_vm5, %v1721_v22, 0.0 }
 0x2ff   : > { %1143 = vadd.xlane.f32.xlu0 %v1142_v23 }
 0x301   : > { %v1723_v24 = vpop.eup %1722 }
 0x302   : > { %v1324_v25 = vsel %vm778_vm5, %v1723_v24, 0.0 }
 0x303   : > { %1325 = vadd.xlane.f32.xlu1 %v1324_v25 }
 0x315   : > { %440 = vperm.xlu0 %1712, %v437_v28  }
 0x316   : > { %v611_v26 = vpop.xlane.xlu1 %610 }
 0x317   : > { %1724 = vrcp.f32 %v611_v26 }
 0x319   : > { %1713 = vset.pattern.permute.xlu0 %v1748_v14  ;;  %v1601_v14 = vpop.f32.mrb[1].mxu1 }
 0x31a   : > { %v787_v27 = vpop.xlane.xlu0 %786 }
 0x31b   : > { %1726 = vrcp.f32 %v787_v27 }
 0x321   : > { %v1725_v29 = vpop.eup %1724 }
 0x322   : > { %v613_v30 = vmul.f32 %v1725_v29, %v1715_v5 }
 0x324   : > { %1608 = vmatpush3.msk.msra.mxu1 %vm618_vm6, %v613_v30 }
 0x325   : > { %v1727_v32 = vpop.eup %1726  ;;  %1617 = vmatprep.subr.mxu1 %v1744_v1  ;;  %1610 = vmatmul.mubr.msk.f32.vlgmr.msra.gmra.mrb[2].mxu1 %vm614_vm7, %v518_v31 }
 0x326   : > { %v789_v33 = vmul.f32 %v1727_v32, %v1717_v7  ;;  %1619 = vmatprep.mubr.msk.f32.mxu1 %vm1743_vm0, %v1744_v1 }
 0x328   : > { %1618 = vmatpush3.msk.msra.mxu1 %vm618_vm6, %v789_v33 }
 0x329   : > { %1620 = vmatmul.mubr.msk.f32.vlgmr.msra.gmra.mrb[4].mxu1 %vm614_vm7, %v518_v31  ;;  %1627 = vmatprep.subr.mxu1 %v1744_v1 }
 0x32a   : > { %1629 = vmatprep.mubr.msk.f32.mxu1 %vm1743_vm0, %v1744_v1 }
 0x388   : > { %v962_v35 = vpop.xlane.xlu1 %961 }
 0x389   : > { %1728 = vrcp.f32 %v962_v35 }
 0x38c   : > { %v1144_v36 = vpop.xlane.xlu0 %1143 }
 0x38d   : > { %1730 = vrcp.f32 %v1144_v36 }
 0x390   : > { %v1326_v37 = vpop.xlane.xlu1 %1325 }
 0x391   : > { %1732 = vrcp.f32 %v1326_v37 }
 0x393   : > { %v1729_v38 = vpop.eup %1728 }
 0x394   : > { %v964_v39 = vmul.f32 %v1729_v38, %v1719_v20  ;;  %v441_v44 = vpop.permute.xlu0 %440 }
 0x395   : > { %v513_v45 = vadd.f32 %v512_v34, %v441_v44 }
 0x396   : > { %1628 = vmatpush3.msk.msra.mxu1 %vm618_vm6, %v964_v39 }
 0x397   : > { %v1731_v40 = vpop.eup %1730  ;;  %1630 = vmatmul.mubr.msk.f32.vlgmr.msra.gmra.mrb[6].mxu1 %vm614_vm7, %v518_v31  ;;  %1637 = vmatprep.subr.mxu1 %v1744_v1  ;;  %516 = vst.msk [vmem:[#allocation3] sm:$0xff] %vm434_vm3, %v513_v45 }
 0x398   : > { %v1146_v41 = vmul.f32 %v1731_v40, %v1721_v22  ;;  %1639 = vmatprep.mubr.msk.f32.mxu1 %vm1743_vm0, %v1744_v1 }
 0x39a   : > { %1638 = vmatpush3.msk.msra.mxu1 %vm618_vm6, %v1146_v41 }
 0x39b   : > { %v1733_v42 = vpop.eup %1732  ;;  %1640 = vmatmul.mubr.msk.f32.vlgmr.msra.gmra.mrb[8].mxu1 %vm614_vm7, %v518_v31  ;;  %1647 = vmatprep.subr.mxu1 %v1744_v1 }
 0x39c   : > { %v1328_v43 = vmul.f32 %v1733_v42, %v1723_v24  ;;  %1649 = vmatprep.mubr.msk.f32.mxu1 %vm1743_vm0, %v1744_v1 }
 0x39e   : > { %1648 = vmatpush3.msk.msra.mxu1 %vm618_vm6, %v1328_v43  ;;  %v521_v46 = vld [vmem:[#allocation3] sm:$0xff] }
 0x39f   : > { %1650 = vmatmul.mubr.msk.f32.vlgmr.msra.gmra.mrb[10].mxu1 %vm614_vm7, %v518_v31 }
 0x3f8   : > { %v688_v47 = vpop.f32.mrb[2].mxu1 }
 0x3f9   : > { %v692_v48 = vmul.f32 %v688_v47, %v521_v46  ;;  %v1611_v49 = vpop.f32.mrb[3].mxu1 }
 0x3fb   : > { %v693_v50 = vsel %vm434_vm3, %v692_v48, 0.0 }
 0x3fc   : > { %v859_v51 = vpop.f32.mrb[4].mxu1  ;;  %694 = vadd.xlane.f32.xlu1 %v693_v50 }
 0x3fd   : > { %v1621_v52 = vpop.f32.mrb[5].mxu1  ;;  %v863_v59 = vmul.f32 %v859_v51, %v521_v46 }
 0x3ff   : > { %v865_v60 = vsel %vm864_vm9, %v863_v59, 0.0 }
 0x46a   : > { %v1034_v53 = vpop.f32.mrb[6].mxu1 }
 0x46b   : > { %1039 = vrot.lane.b32.xlu1 %v1034_v53, %s1753_s11  ;;  %v1631_v1 = vpop.f32.mrb[7].mxu1 }
 0x46e   : > { %v1216_v54 = vpop.f32.mrb[8].mxu1 }
 0x46f   : > { %1221 = vrot.lane.b32.xlu1 %v1216_v54, %s1754_s12  ;;  %v1641_v55 = vpop.f32.mrb[9].mxu1 }
 0x472   : > { %v1398_v56 = vpop.f32.mrb[10].mxu1 }
 0x473   : > { %1403 = vrot.lane.b32.xlu1 %v1398_v56, %s1755_s13  ;;  %v1651_v57 = vpop.f32.mrb[11].mxu1 }
 0x489   : > { %v695_v58 = vpop.xlane.xlu1 %694 }
 0x48a   : > { %697 = vst.msk [vmem:[%s1945_s16] sm:$0xff] %vm696_vm8, %v695_v58 }
 0x497   : > { %866 = vadd.xlane.f32.xlu1 %v865_v60 }
 0x4dd   : > { %v1040_v61 = vpop.permute.xlu1 %1039 }
 0x4de   : > { %v1042_v62 = vmul.f32 %v1040_v61, %v521_v46 }
 0x4e0   : > { %1044 = vrot.lane.b32.xlu0 %v1042_v62, %s1751_s22 }
 0x4e1   : > { %v1222_v63 = vpop.permute.xlu1 %1221 }
 0x4e2   : > { %v1224_v0 = vmul.f32 %v1222_v63, %v521_v46 }
 0x4e4   : > { %1226 = vrot.lane.b32.xlu1 %v1224_v0, %s1752_s23 }
 0x4e5   : > { %v1404_v2 = vpop.permute.xlu1 %1403 }
 0x4e6   : > { %v1406_v3 = vmul.f32 %v1404_v2, %v521_v46 }
 0x4e8   : > { %1408 = vrot.lane.b32.xlu0 %v1406_v3, %s1750_s21 }
 0x524   : > { %v867_v4 = vpop.xlane.xlu1 %866 }
 0x525   : > { %869 = vst.msk [vmem:[%s1945_s16] sm:$0xff] %vm868_vm10, %v867_v4 }
 0x552   : > { %v1045_v5 = vpop.permute.xlu0 %1044 }
 0x553   : > { %v1047_v6 = vsel %vm864_vm9, %v1045_v5, 0.0 }
 0x554   : > { %1048 = vadd.xlane.f32.xlu0 %v1047_v6 }
 0x556   : > { %v1227_v7 = vpop.permute.xlu1 %1226 }
 0x557   : > { %v1229_v8 = vsel %vm864_vm9, %v1227_v7, 0.0 }
 0x558   : > { %1230 = vadd.xlane.f32.xlu1 %v1229_v8 }
 0x55a   : > { %v1409_v9 = vpop.permute.xlu0 %1408 }
 0x55b   : > { %v1411_v10 = vsel %vm864_vm9, %v1409_v9, 0.0 }
 0x55c   : > { %1412 = vadd.xlane.f32.xlu0 %v1411_v10 }
 0x5e1   : > { %v1049_v11 = vpop.xlane.xlu0 %1048 }
 0x5e2   : > { %1051 = vst.msk [vmem:[%s1945_s16] sm:$0xff] %vm1050_vm11, %v1049_v11 }
 0x5e5   : > { %v1231_v12 = vpop.xlane.xlu1 %1230 }
 0x5e6   : > { %1233 = vst.msk [vmem:[%s1945_s16] sm:$0xff] %vm1232_vm12, %v1231_v12 }
 0x5e9   : > { %v1413_v13 = vpop.xlane.xlu0 %1412 }
 0x5ea   : > { %1415 = vst.msk [vmem:[%s1945_s16] sm:$0xff] %vm1414_vm13, %v1413_v13 }
 0x5eb PF: > { %s18_s27 = sadd.s32 1, %s1740_s27  }
 0x5ec   : > { %p15_p4 = scmp.ge.s32.totalorder %s18_s27, 4  }
 0x5ee   :  { %17 = sbr.rel (!%p15_p4) target bundleno = 1 (0x1), region = 85 }

</bundles_post_ra>
